<compile_context>
chip_gen: v7x
topology: tpu7x:2x2x1
jax: 0.10.0
libtpu: 0.0.40
codegen_flags: <defaults>
</compile_context>

<pallas_src>
import math

import jax
import jax.numpy as jnp
from jax import lax
from jax.experimental import pallas as pl
from jax.experimental.pallas import tpu as pltpu


_TWO_PI = 2.0 * math.pi  # plain Python float -> inlined literal, never a captured constant


def _make_nufft_partial_kernel(H, W, B, tile_m, use_bf16):
    """Per-(core, M-tile) kernel: forward NDFT -> weights -> adjoint NDFT, accumulated
    into this core's partial image block."""
    BH = B * H
    mm_dtype = jnp.bfloat16 if use_bf16 else jnp.float32

    def kernel(traj_ref, w_ref, x_ref, pre_ref, pim_ref):
        # zero this core's partial accumulator at its first M-tile
        @pl.when(pl.program_id(1) == 0)
        def _init():
            pre_ref[...] = jnp.zeros_like(pre_ref)
            pim_ref[...] = jnp.zeros_like(pim_ref)

        # ---- separable phase panels, generated on-chip (lane axis = tile_m) ---------
        kx = traj_ref[0:1, :]                                        # (1, tile_m)
        ky = traj_ref[1:2, :]                                        # (1, tile_m)
        u = (lax.broadcasted_iota(jnp.int32, (H, 1), 0).astype(jnp.float32)
             - float(H // 2))                                        # (H, 1) pixel coords
        v = (lax.broadcasted_iota(jnp.int32, (W, 1), 0).astype(jnp.float32)
             - float(W // 2))                                        # (W, 1)

        phi_u = (_TWO_PI * u) * kx                                   # (H, tile_m)
        phi_v = (_TWO_PI * v) * ky                                   # (W, tile_m)
        cu, su = jnp.cos(phi_u), jnp.sin(phi_u)                      # f32 panels
        cv, sv = jnp.cos(phi_v), jnp.sin(phi_v)
        cv_mm = cv.astype(mm_dtype)                                  # matmul operands only
        sv_mm = sv.astype(mm_dtype)

        # ---- forward op (type-2 NDFT): k[b,m] = sum_{h,w} x * exp(-i*phi) -----------
        # stage 1 (MXU): contract W against Ev; x is row-stacked [re; im] -> 2 dots
        dn_w = (((1,), (0,)), ((), ()))                              # (2BH,W)x(W,tm)->(2BH,tm)
        xc = lax.dot_general(x_ref[...], cv_mm, dn_w, preferred_element_type=jnp.float32)
        xs = lax.dot_general(x_ref[...], sv_mm, dn_w, preferred_element_type=jnp.float32)
        t_r = (xc[:BH] + xs[BH:]).reshape(B, H, tile_m)
        t_i = (xc[BH:] - xs[:BH]).reshape(B, H, tile_m)

        # stage 2 (VPU + sublane reduce over H): contract H against Eu
        cu_b = cu[None]                                              # (1, H, tile_m)
        su_b = su[None]
        k_r = jnp.sum(t_r * cu_b + t_i * su_b, axis=1)               # (B, tile_m)
        k_i = jnp.sum(t_i * cu_b - t_r * su_b, axis=1)

        # density-compensation weights (uniform) doubling as the M-padding mask
        wgt = w_ref[...]                                             # (1, tile_m)
        k_r = k_r * wgt
        k_i = k_i * wgt

        # ---- adjoint op (type-1 NDFT): a[b,h,w] += sum_m k * exp(+i*phi) ------------
        # stage 1 (VPU): spread k over H with conj(Eu)
        g_r = k_r[:, None, :] * cu_b - k_i[:, None, :] * su_b        # (B, H, tile_m)
        g_i = k_i[:, None, :] * cu_b + k_r[:, None, :] * su_b
        g = jnp.concatenate([g_r, g_i], axis=0).reshape(2 * BH, tile_m).astype(mm_dtype)

        # stage 2 (MXU): contract tile_m against conj(Ev) -> 2 dots, accumulate
        dn_m = (((1,), (1,)), ((), ()))                              # (2BH,tm)x(W,tm)->(2BH,W)
        gc = lax.dot_general(g, cv_mm, dn_m, preferred_element_type=jnp.float32)
        gs = lax.dot_general(g, sv_mm, dn_m, preferred_element_type=jnp.float32)
        pre_ref[...] += gc[:BH] - gs[BH:]
        pim_ref[...] += gc[BH:] + gs[:BH]

    return kernel


def _make_finalize_kernel(n_splits, BH):
    """Second pass: sum per-core partial adjoints, normalise by the global Frobenius norm."""

    def kernel(pre_ref, pim_ref, ore_ref, oim_ref):
        are = pre_ref[0:BH, :]
        aim = pim_ref[0:BH, :]
        for s in range(1, n_splits):                                 # static, tiny
            are = are + pre_ref[s * BH:(s + 1) * BH, :]
            aim = aim + pim_ref[s * BH:(s + 1) * BH, :]
        nsq = jnp.sum(are * are + aim * aim)
        # NOTE: no epsilon guard, matching torch.linalg.norm (zero input -> nan/inf)
        inv = lax.rsqrt(nsq)
        ore_ref[...] = are * inv
        oim_ref[...] = aim * inv

    return kernel


def nufft_model_forward(x, trajectory, *, tile_m=128, n_splits=2, use_bf16=True):
    """x: complex64 (n_batch, n_coils, H, W); trajectory: float32 (M, 2) in [-0.5, 0.5)."""
    n_batch, n_coils, H, W = x.shape
    B = n_batch * n_coils
    BH = B * H
    M = trajectory.shape[0]

    # pad M up to a multiple of n_splits*tile_m; padded samples get zero weight
    chunk = n_splits * tile_m
    m_pad = ((M + chunk - 1) // chunk) * chunk
    mts = m_pad // chunk                                             # M-tiles per core

    traj_t = jnp.zeros((2, m_pad), jnp.float32).at[:, :M].set(
        trajectory.astype(jnp.float32).T)                            # (2, m_pad), lane-dense
    weights = (jnp.arange(m_pad) < M).astype(jnp.float32)[None, :]   # (1, m_pad)

    in_dtype = jnp.bfloat16 if use_bf16 else jnp.float32
    x_flat = x.reshape(BH, W)
    x_stack = jnp.concatenate(
        [jnp.real(x_flat), jnp.imag(x_flat)], axis=0).astype(in_dtype)   # (2BH, W)

    partial_kernel = _make_nufft_partial_kernel(H, W, B, tile_m, use_bf16)
    pre, pim = pl.pallas_call(
        partial_kernel,
        out_shape=(
            jax.ShapeDtypeStruct((n_splits * BH, W), jnp.float32),
            jax.ShapeDtypeStruct((n_splits * BH, W), jnp.float32),
        ),
        grid=(n_splits, mts),
        in_specs=[
            pl.BlockSpec((2, tile_m), lambda c, m: (0, c * mts + m)),   # trajectory tile
            pl.BlockSpec((1, tile_m), lambda c, m: (0, c * mts + m)),   # density / pad mask
            pl.BlockSpec((2 * BH, W), lambda c, m: (0, 0)),             # x (resident)
        ],
        out_specs=(
            pl.BlockSpec((BH, W), lambda c, m: (c, 0)),                 # per-core partial re
            pl.BlockSpec((BH, W), lambda c, m: (c, 0)),                 # per-core partial im
        ),
        compiler_params=pltpu.CompilerParams(
            dimension_semantics=("parallel", "arbitrary"),              # split M across cores
            vmem_limit_bytes=64 * 1024 * 1024,
        ),
    )(traj_t, weights, x_stack)

    finalize_kernel = _make_finalize_kernel(n_splits, BH)
    ore, oim = pl.pallas_call(
        finalize_kernel,
        out_shape=(
            jax.ShapeDtypeStruct((BH, W), jnp.float32),
            jax.ShapeDtypeStruct((BH, W), jnp.float32),
        ),
    )(pre, pim)

    out = (ore + 1j * oim).astype(jnp.complex64)                     # (BH, W)
    return out.reshape(n_batch, n_coils, H, W)


def make_radial_trajectory(n_spokes, n_per_spoke):
    """Deterministic small radial trajectory, normalized to [-0.5, 0.5)."""
    angles = jnp.arange(n_spokes, dtype=jnp.float32) * (jnp.pi / n_spokes)
    radii = jnp.linspace(-0.5, 0.5, n_per_spoke, endpoint=False, dtype=jnp.float32)
    kx = radii[None, :] * jnp.cos(angles)[:, None]
    ky = radii[None, :] * jnp.sin(angles)[:, None]
    traj = jnp.stack([kx.reshape(-1), ky.reshape(-1)], axis=-1)      # (M, 2)
    return traj.astype(jnp.float32)


if __name__ == "__main__":
    # small shapes: batch=2, coils=1, image 16x16, M = 32 spokes * 16 samples = 512
    # (M = 512 = 2 cores x 2 tiles of 128 -> exercises both the parallel split and the
    #  per-core accumulation over multiple M-tiles)
    key = jax.random.PRNGKey(0)
    k_re, k_im = jax.random.split(key)
    n_batch, n_coils, H, W = 2, 1, 16, 16
    # TODO(synk): the PyTorch module targets shape=(256, 256); small image used for smoke test.

    x = (jax.random.normal(k_re, (n_batch, n_coils, H, W), dtype=jnp.float32)
         + 1j * jax.random.normal(k_im, (n_batch, n_coils, H, W), dtype=jnp.float32)
         ).astype(jnp.complex64)

    trajectory = make_radial_trajectory(n_spokes=32, n_per_spoke=16)   # (512, 2) learnable param

    out = nufft_model_forward(x, trajectory)
    out = jax.block_until_ready(out)

    assert out.shape == (n_batch, n_coils, H, W)
    assert out.dtype == jnp.complex64
    assert bool(jnp.isfinite(jnp.real(out)).all())
    print("KERNEL_OK")
</pallas_src>

<mosaic_0001>
module attributes {stable_mosaic.version = 11 : i64} {
  func.func @kernel(%arg0: i32, %arg1: i32, %arg2: memref<2x128xf32, #tpu.memory_space<vmem>>, %arg3: memref<1x128xf32, #tpu.memory_space<vmem>>, %arg4: memref<64x16xbf16, #tpu.memory_space<vmem>>, %arg5: memref<32x16xf32, #tpu.memory_space<vmem>>, %arg6: memref<32x16xf32, #tpu.memory_space<vmem>>) attributes {dimension_semantics = [#tpu.dimension_semantics<parallel>, #tpu.dimension_semantics<arbitrary>], iteration_bounds = array<i64: 2, 2>, scalar_prefetch = 0 : i64, scratch_operands = 0 : i64, tpu.core_type = #tpu.core_type<tc>, window_params = [{transform_indices = @transform_0, window_bounds = array<i64: 2, 128>}, {transform_indices = @transform_1, window_bounds = array<i64: 1, 128>}, {pipeline_mode = #tpu.pipeline_mode<synchronous>, transform_indices = @transform_2, window_bounds = array<i64: 64, 16>}, {transform_indices = @transform_3, window_bounds = array<i64: 32, 16>}, {transform_indices = @transform_4, window_bounds = array<i64: 32, 16>}]} {
    %c0_i32 = arith.constant 0 : i32
    %0 = arith.cmpi eq, %arg1, %c0_i32 : i32
    %1 = arith.extui %0 : i1 to i32
    %c0_i32_0 = arith.constant 0 : i32
    %2 = arith.cmpi ne, %1, %c0_i32_0 : i32
    scf.if %2 {
      %cst_26 = arith.constant 0.000000e+00 : f32
      %95 = vector.broadcast %cst_26 : f32 to vector<32x16xf32>
      %c0_27 = arith.constant 0 : index
      %c0_28 = arith.constant 0 : index
      %96 = vector.load %arg5[%c0_27, %c0_28] : memref<32x16xf32, #tpu.memory_space<vmem>>, vector<32x16xf32>
      tpu.vector_store %arg5[%c0_27, %c0_28], %95 {strides = array<i32>} : memref<32x16xf32, #tpu.memory_space<vmem>>, vector<32x16xf32>,
      %cst_29 = arith.constant 0.000000e+00 : f32
      %97 = vector.broadcast %cst_29 : f32 to vector<32x16xf32>
      %c0_30 = arith.constant 0 : index
      %c0_31 = arith.constant 0 : index
      %98 = vector.load %arg6[%c0_30, %c0_31] : memref<32x16xf32, #tpu.memory_space<vmem>>, vector<32x16xf32>
      tpu.vector_store %arg6[%c0_30, %c0_31], %97 {strides = array<i32>} : memref<32x16xf32, #tpu.memory_space<vmem>>, vector<32x16xf32>,
    } else {
    }
    %c0 = arith.constant 0 : index
    %c0_1 = arith.constant 0 : index
    %3 = vector.load %arg2[%c0, %c0_1] : memref<2x128xf32, #tpu.memory_space<vmem>>, vector<1x128xf32>
    %c1 = arith.constant 1 : index
    %c0_2 = arith.constant 0 : index
    %4 = vector.load %arg2[%c1, %c0_2] : memref<2x128xf32, #tpu.memory_space<vmem>>, vector<1x128xf32>
    %5 = tpu.iota {dimensions = array<i32: 0>} : vector<16x1xi32>
    %6 = arith.sitofp %5 : vector<16x1xi32> to vector<16x1xf32>
    %cst = arith.constant 8.000000e+00 : f32
    %7 = vector.broadcast %cst : f32 to vector<16x1xf32>
    %8 = arith.subf %6, %7 : vector<16x1xf32>
    %9 = tpu.iota {dimensions = array<i32: 0>} : vector<16x1xi32>
    %10 = arith.sitofp %9 : vector<16x1xi32> to vector<16x1xf32>
    %cst_3 = arith.constant 8.000000e+00 : f32
    %11 = vector.broadcast %cst_3 : f32 to vector<16x1xf32>
    %12 = arith.subf %10, %11 : vector<16x1xf32>
    %cst_4 = arith.constant 6.28318548 : f32
    %13 = vector.broadcast %cst_4 : f32 to vector<16x1xf32>
    %14 = arith.mulf %13, %8 : vector<16x1xf32>
    %15 = vector.broadcast %14 : vector<16x1xf32> to vector<16x128xf32>
    %16 = vector.broadcast %3 : vector<1x128xf32> to vector<16x128xf32>
    %17 = arith.mulf %15, %16 : vector<16x128xf32>
    %cst_5 = arith.constant 6.28318548 : f32
    %18 = vector.broadcast %cst_5 : f32 to vector<16x1xf32>
    %19 = arith.mulf %18, %12 : vector<16x1xf32>
    %20 = vector.broadcast %19 : vector<16x1xf32> to vector<16x128xf32>
    %21 = vector.broadcast %4 : vector<1x128xf32> to vector<16x128xf32>
    %22 = arith.mulf %20, %21 : vector<16x128xf32>
    %23 = math.cos %17 : vector<16x128xf32>
    %24 = math.sin %17 : vector<16x128xf32>
    %25 = math.cos %22 : vector<16x128xf32>
    %26 = math.sin %22 : vector<16x128xf32>
    %27 = arith.truncf %25 : vector<16x128xf32> to vector<16x128xbf16>
    %28 = arith.truncf %26 : vector<16x128xf32> to vector<16x128xbf16>
    %c0_6 = arith.constant 0 : index
    %c0_7 = arith.constant 0 : index
    %29 = vector.load %arg4[%c0_6, %c0_7] : memref<64x16xbf16, #tpu.memory_space<vmem>>, vector<64x16xbf16>
    %cst_8 = arith.constant dense<0.000000e+00> : vector<64x128xf32>
    %30 = tpu.matmul %29, %27, %cst_8 {dimension_numbers = #tpu.dot_dimension_numbers<[1], [0], [0], [1], [0, 0, 1, 1], [], []>} : vector<64x16xbf16>, vector<16x128xbf16>, vector<64x128xf32> -> vector<64x128xf32>
    %c0_9 = arith.constant 0 : index
    %c0_10 = arith.constant 0 : index
    %31 = vector.load %arg4[%c0_9, %c0_10] : memref<64x16xbf16, #tpu.memory_space<vmem>>, vector<64x16xbf16>
    %cst_11 = arith.constant dense<0.000000e+00> : vector<64x128xf32>
    %32 = tpu.matmul %31, %28, %cst_11 {dimension_numbers = #tpu.dot_dimension_numbers<[1], [0], [0], [1], [0, 0, 1, 1], [], []>} : vector<64x16xbf16>, vector<16x128xbf16>, vector<64x128xf32> -> vector<64x128xf32>
    %33 = vector.extract_strided_slice %30 {offsets = [0, 0], sizes = [32, 128], strides = [1, 1]} : vector<64x128xf32> to vector<32x128xf32>
    %34 = vector.extract_strided_slice %32 {offsets = [32, 0], sizes = [32, 128], strides = [1, 1]} : vector<64x128xf32> to vector<32x128xf32>
    %35 = arith.addf %33, %34 : vector<32x128xf32>
    %36 = vector.shape_cast %35 : vector<32x128xf32> to vector<2x16x128xf32>
    %37 = vector.extract_strided_slice %30 {offsets = [32, 0], sizes = [32, 128], strides = [1, 1]} : vector<64x128xf32> to vector<32x128xf32>
    %38 = vector.extract_strided_slice %32 {offsets = [0, 0], sizes = [32, 128], strides = [1, 1]} : vector<64x128xf32> to vector<32x128xf32>
    %39 = arith.subf %37, %38 : vector<32x128xf32>
    %40 = vector.shape_cast %39 : vector<32x128xf32> to vector<2x16x128xf32>
    %41 = vector.shape_cast %23 : vector<16x128xf32> to vector<1x16x128xf32>
    %42 = vector.shape_cast %24 : vector<16x128xf32> to vector<1x16x128xf32>
    %43 = vector.broadcast %41 : vector<1x16x128xf32> to vector<2x16x128xf32>
    %44 = arith.mulf %36, %43 : vector<2x16x128xf32>
    %45 = vector.broadcast %42 : vector<1x16x128xf32> to vector<2x16x128xf32>
    %46 = arith.mulf %40, %45 : vector<2x16x128xf32>
    %47 = arith.addf %44, %46 : vector<2x16x128xf32>
    %cst_12 = arith.constant dense<0.000000e+00> : vector<2x128xf32>
    %48 = vector.multi_reduction <add>, %47, %cst_12 [1] : vector<2x16x128xf32> to vector<2x128xf32>
    %49 = vector.broadcast %41 : vector<1x16x128xf32> to vector<2x16x128xf32>
    %50 = arith.mulf %40, %49 : vector<2x16x128xf32>
    %51 = vector.broadcast %42 : vector<1x16x128xf32> to vector<2x16x128xf32>
    %52 = arith.mulf %36, %51 : vector<2x16x128xf32>
    %53 = arith.subf %50, %52 : vector<2x16x128xf32>
    %cst_13 = arith.constant dense<0.000000e+00> : vector<2x128xf32>
    %54 = vector.multi_reduction <add>, %53, %cst_13 [1] : vector<2x16x128xf32> to vector<2x128xf32>
    %c0_14 = arith.constant 0 : index
    %c0_15 = arith.constant 0 : index
    %55 = vector.load %arg3[%c0_14, %c0_15] : memref<1x128xf32, #tpu.memory_space<vmem>>, vector<1x128xf32>
    %56 = vector.broadcast %55 : vector<1x128xf32> to vector<2x128xf32>
    %57 = arith.mulf %48, %56 : vector<2x128xf32>
    %58 = vector.broadcast %55 : vector<1x128xf32> to vector<2x128xf32>
    %59 = arith.mulf %54, %58 : vector<2x128xf32>
    %60 = vector.shape_cast %57 : vector<2x128xf32> to vector<2x1x128xf32>
    %61 = vector.broadcast %60 : vector<2x1x128xf32> to vector<2x16x128xf32>
    %62 = vector.broadcast %41 : vector<1x16x128xf32> to vector<2x16x128xf32>
    %63 = arith.mulf %61, %62 : vector<2x16x128xf32>
    %64 = vector.shape_cast %59 : vector<2x128xf32> to vector<2x1x128xf32>
    %65 = vector.broadcast %64 : vector<2x1x128xf32> to vector<2x16x128xf32>
    %66 = vector.broadcast %42 : vector<1x16x128xf32> to vector<2x16x128xf32>
    %67 = arith.mulf %65, %66 : vector<2x16x128xf32>
    %68 = arith.subf %63, %67 : vector<2x16x128xf32>
    %69 = vector.shape_cast %59 : vector<2x128xf32> to vector<2x1x128xf32>
    %70 = vector.broadcast %69 : vector<2x1x128xf32> to vector<2x16x128xf32>
    %71 = vector.broadcast %41 : vector<1x16x128xf32> to vector<2x16x128xf32>
    %72 = arith.mulf %70, %71 : vector<2x16x128xf32>
    %73 = vector.shape_cast %57 : vector<2x128xf32> to vector<2x1x128xf32>
    %74 = vector.broadcast %73 : vector<2x1x128xf32> to vector<2x16x128xf32>
    %75 = vector.broadcast %42 : vector<1x16x128xf32> to vector<2x16x128xf32>
    %76 = arith.mulf %74, %75 : vector<2x16x128xf32>
    %77 = arith.addf %72, %76 : vector<2x16x128xf32>
    %78 = tpu.concatenate %68, %77 in 0 : vector<2x16x128xf32>, vector<2x16x128xf32> -> vector<4x16x128xf32>
    %79 = vector.shape_cast %78 : vector<4x16x128xf32> to vector<64x128xf32>
    %80 = arith.truncf %79 : vector<64x128xf32> to vector<64x128xbf16>
    %cst_16 = arith.constant dense<0.000000e+00> : vector<64x16xf32>
    %81 = tpu.matmul %80, %27, %cst_16 {dimension_numbers = #tpu.dot_dimension_numbers<[1], [1], [0], [0], [0, 0, 1, 0], [], []>} : vector<64x128xbf16>, vector<16x128xbf16>, vector<64x16xf32> -> vector<64x16xf32>
    %cst_17 = arith.constant dense<0.000000e+00> : vector<64x16xf32>
    %82 = tpu.matmul %80, %28, %cst_17 {dimension_numbers = #tpu.dot_dimension_numbers<[1], [1], [0], [0], [0, 0, 1, 0], [], []>} : vector<64x128xbf16>, vector<16x128xbf16>, vector<64x16xf32> -> vector<64x16xf32>
    %c0_18 = arith.constant 0 : index
    %c0_19 = arith.constant 0 : index
    %83 = vector.load %arg5[%c0_18, %c0_19] : memref<32x16xf32, #tpu.memory_space<vmem>>, vector<32x16xf32>
    %84 = vector.extract_strided_slice %81 {offsets = [0, 0], sizes = [32, 16], strides = [1, 1]} : vector<64x16xf32> to vector<32x16xf32>
    %85 = vector.extract_strided_slice %82 {offsets = [32, 0], sizes = [32, 16], strides = [1, 1]} : vector<64x16xf32> to vector<32x16xf32>
    %86 = arith.subf %84, %85 : vector<32x16xf32>
    %87 = arith.addf %83, %86 : vector<32x16xf32>
    %c0_20 = arith.constant 0 : index
    %c0_21 = arith.constant 0 : index
    %88 = vector.load %arg5[%c0_20, %c0_21] : memref<32x16xf32, #tpu.memory_space<vmem>>, vector<32x16xf32>
    tpu.vector_store %arg5[%c0_20, %c0_21], %87 {strides = array<i32>} : memref<32x16xf32, #tpu.memory_space<vmem>>, vector<32x16xf32>,
    %c0_22 = arith.constant 0 : index
    %c0_23 = arith.constant 0 : index
    %89 = vector.load %arg6[%c0_22, %c0_23] : memref<32x16xf32, #tpu.memory_space<vmem>>, vector<32x16xf32>
    %90 = vector.extract_strided_slice %81 {offsets = [32, 0], sizes = [32, 16], strides = [1, 1]} : vector<64x16xf32> to vector<32x16xf32>
    %91 = vector.extract_strided_slice %82 {offsets = [0, 0], sizes = [32, 16], strides = [1, 1]} : vector<64x16xf32> to vector<32x16xf32>
    %92 = arith.addf %90, %91 : vector<32x16xf32>
    %93 = arith.addf %89, %92 : vector<32x16xf32>
    %c0_24 = arith.constant 0 : index
    %c0_25 = arith.constant 0 : index
    %94 = vector.load %arg6[%c0_24, %c0_25] : memref<32x16xf32, #tpu.memory_space<vmem>>, vector<32x16xf32>
    tpu.vector_store %arg6[%c0_24, %c0_25], %93 {strides = array<i32>} : memref<32x16xf32, #tpu.memory_space<vmem>>, vector<32x16xf32>,
    return
  }
  func.func @transform_0(%arg0: i32, %arg1: i32) -> (i32, i32) {
    %c2_i32 = arith.constant 2 : i32
    %0 = arith.muli %arg0, %c2_i32 : i32
    %1 = arith.addi %0, %arg1 : i32
    %c0_i32 = arith.constant 0 : i32
    %c0_i32_0 = arith.constant 0 : i32
    return %c0_i32, %1 : i32, i32
  }
  func.func @transform_1(%arg0: i32, %arg1: i32) -> (i32, i32) {
    %c2_i32 = arith.constant 2 : i32
    %0 = arith.muli %arg0, %c2_i32 : i32
    %1 = arith.addi %0, %arg1 : i32
    %c0_i32 = arith.constant 0 : i32
    %c0_i32_0 = arith.constant 0 : i32
    return %c0_i32, %1 : i32, i32
  }
  func.func @transform_2(%arg0: i32, %arg1: i32) -> (i32, i32) {
    %c0_i32 = arith.constant 0 : i32
    %c0_i32_0 = arith.constant 0 : i32
    %c0_i32_1 = arith.constant 0 : i32
    return %c0_i32, %c0_i32_0 : i32, i32
  }
  func.func @transform_3(%arg0: i32, %arg1: i32) -> (i32, i32) {
    %c0_i32 = arith.constant 0 : i32
    %c0_i32_0 = arith.constant 0 : i32
    return %arg0, %c0_i32 : i32, i32
  }
  func.func @transform_4(%arg0: i32, %arg1: i32) -> (i32, i32) {
    %c0_i32 = arith.constant 0 : i32
    %c0_i32_0 = arith.constant 0 : i32
    return %arg0, %c0_i32 : i32, i32
  }
}

</mosaic_0001>

<bundles_post_ra>
// kernel: tpu_custom_call.1
= control target key start
LH: loop header
LB: loop body
LE: loop exit
PB: predicated region body
PF: predicated region fallthrough
CT: control target
= control target key end

     0   :  { %s3123_s0 = inlined_call_operand.hbm [shape: f32[2,512], index: 0, kind: input, shape index: {}]   ;;  %s3124_s1 = inlined_call_operand.hbm [shape: f32[1,512], index: 1, kind: input, shape index: {}]   ;;  %s3125_s2 = inlined_call_operand.hbm [shape: bf16[64,16], index: 2, kind: input, shape index: {}]   ;;  %s3126_s3 = inlined_call_operand.hbm [shape: f32[64,16], index: 3, kind: output, shape index: {0}]   ;;  %s3127_s4 = inlined_call_operand.hbm [shape: f32[64,16], index: 4, kind: output, shape index: {1}]  }
   0x1   :  { %3141 = sst [smem:[#allocation22_spill]] %s3125_s2 }
   0x2   :  { %3142 = sst [smem:[#allocation23_spill]] %s3126_s3 }
   0x3   :  { %3143 = sst [smem:[#allocation24_spill]] %s3127_s4 }
   0x4   :  { %10 = vsyncpa [#allocation3], 0 }
   0x5   :  { %12 = vsyncpa [#allocation3 + $0x1], 0 }
   0x6   :  { %13 = vsyncpa [#allocation6], 0 }
   0x7   :  { %15 = vsyncpa [#allocation6 + $0x1], 0 }
   0x8   :  { %16 = vsyncpa [#allocation4], 0 }
   0x9   :  { %18 = vsyncpa [#allocation4 + $0x1], 0 }
   0xa   :  { %19 = vsyncpa [#allocation10], 0 }
   0xb   :  { %21 = vsyncpa [#allocation10 + $0x1], 0  ;;  %s2411_s15 = smov 0   ;;  %s2413_s16 = smov 0  }
   0xc   :  { %s2415_s17 = smov 0   ;;  %s2417_s18 = smov 0  }
   0xd   :  { %s2419_s19 = smov 0   ;;  %s2421_s20 = smov 0  }
   0xe   :  { %s2423_s21 = smov 0   ;;  %s2425_s22 = smov 0  }
   0xf   :  { %s2427_s23 = smov 0   ;;  %s2429_s24 = smov 0  }
  0x10   :  { %s2431_s25 = smov 0  }
  0x11 LB: > { %3144 = sst [smem:[#allocation16_spill]] %s2328_s15  ;;  %s2465_s26 = sadd.s32 4294967295, %s2368_s25   ;;  %s2368_s25 = sphi %s2431_s25, %s27_s25   ;;  %s2364_s24 = sphi %s2429_s24, %s3183_s24   ;;  %s2360_s23 = sphi %s2427_s23, %s3182_s23   ;;  %s2356_s22 = sphi %s2425_s22, %s3181_s22   ;;  %s2352_s21 = sphi %s2423_s21, %s3173_s21   ;;  %s2348_s20 = sphi %s2421_s20, %s3180_s20   ;;  %s2344_s19 = sphi %s2419_s19, %s3179_s19   ;;  %s2340_s18 = sphi %s2417_s18, %s3178_s18   ;;  %s2336_s17 = sphi %s2415_s17, %s3177_s17   ;;  %s2332_s16 = sphi %s2413_s16, %s3176_s16   ;;  %s2328_s15 = sphi %s2411_s15, %s3175_s15  }
  0x12   : > { %3145 = sst [smem:[#allocation17_spill]] %s2356_s22  ;;  %s1802_s27 = sadd.s32 4294967294, %s2368_s25  }
  0x13   : > { %3146 = sst [smem:[#allocation18_spill]] %s2360_s23  ;;  %p63_p0 = scmp.ne.s32.totalorder %s2344_s19, %s2340_s18 }
  0x14   : > { %p3128_p1 = scmp.eq.s32.totalorder %s2465_s26, 0  ;;  %p137_p2 = scmp.ne.s32.totalorder %s2336_s17, %s2332_s16 }
  0x15   : > { %p138_p3 = scmp.eq.s32.totalorder %s2465_s26, 3  ;;  %p143_p5 = scmp.ne.s32.totalorder %s2332_s16, %s2328_s15 }
  0x16   : > { %p2475_p4 = por %p3128_p1, %p63_p0  ;;  %p144_p7 = scmp.eq.s32.totalorder %s1802_s27, 3 }
  0x17   : > { %p2481_p6 = por %p138_p3, %p137_p2  ;;  %p1807_p8 = scmp.ge.s32.totalorder %s2368_s25, 1 }
  0x18   : > { %s3147_s28 = scalar_select %p2475_p4, 1, 0 }
  0x19   : > { %s3148_s29 = scalar_select %p2481_p6, 1, 0 }
  0x1a   : > { %p177_p9 = scmp.lt.s32.totalorder %s2368_s25, 5  ;;  %p2487_p10 = por %p144_p7, %p143_p5 }
  0x1b   : > { %3149 = sst [smem:[#allocation19_spill]] %s3148_s29  ;;  %s2370_s6 = smov [#allocation7]  }
  0x1c   : > { %s3150_s30 = scalar_select %p2487_p10, 1, 0 }
  0x1d   : > { %p2491_p11 = pnand %p1807_p8, %p177_p9  ;;  %s189_s7 = sshll.u32 %s2370_s6, 4  ;;  %s190_s7 = int_to_ptr.vmem [resolvable:$true] %s189_s7 }
  0x1e   : > { %3151 = sst [smem:[#allocation20_spill]] %s3150_s30 }
  0x1f   : > { %s3152_s5 = scalar_select %p2491_p11, 1, 0 }
  0x20   : > { %p1976_p12 = pneg %p2491_p11  ;;  %s3154_s2 = sld [smem:[#allocation22_spill]] }
  0x22   : > { %p2499_p13 = pnand %p1976_p12, %p3128_p1 }
  0x24   : > { %p2120_p2 = pneg %p2499_p13 }
  0x26   : > { %s2118_s11 = scalar_lea.hbm %s3154_s2, 512 }
  0x27   : > { %p2119_p0 = scmp.ne.s32.totalorder %s3154_s2, %s2118_s11  ;;  %p2125_p7 = scmp.lt.u32.totalorder %s2118_s11, %s3154_s2 }
  0x29   : > { %p2121_p3 = pnand %p2120_p2, %p2119_p0 }
  0x2b   : > { %p2122_p5 = pneg %p2121_p3 }
  0x2d   : > { %p2127_p8 = pnand %p2125_p7, %p2122_p5 }
  0x2f   : > { %2130 = shalt.err (!%p2127_p8)
}
  0x30   : > { %s2131_s27 = scalar_lea.vmem %s190_s7, 512  ;;  %p2139_p10 = scmp.lt.s32.totalorder %s190_s7, %s190_s7 }
  0x31   : > { %p2132_p9 = scmp.ne.s32.totalorder %s190_s7, %s2131_s27  ;;  %p2140_p6 = scmp.lt.s32.totalorder %s2131_s27, %s2131_s27 }
  0x33   : > { %p2134_p12 = pnand %p2132_p9, %p2120_p2  ;;  %p2141_p4 = por %p2140_p6, %p2139_p10 }
  0x35   : > { %p2135_p1 = pneg %p2134_p12 }
  0x37   : > { %p2142_p11 = pnand %p2141_p4, %p2135_p1 }
  0x39   : > { %2145 = shalt.err (!%p2142_p11)
}
  0x3a   : > { %s2371_s6 = smov 64   ;;  %s2372_s9 = smov 4  }
  0x3b   : > { %1979 = dma.hbm_to_vmem [thread:$0]  (!%p2499_p13), %s3154_s2, 512, %s190_s7, [#allocation6], %s2371_s6, %s2371_s6, %s2372_s9  }
  0x3c   : > { %s36_s12 = sadd.s32 1, %s2360_s23  ;;  %s39_s13 = sadd.s32 1, %s2364_s24 }
  0x3d   : > { %p37_p1 = scmp.ge.s32.totalorder %s36_s12, 2  ;;  %s1803_s14 = sshll.u32 %s2364_s24, 1 }
  0x3e   : > { %s2523_s18 = sadd.s32 %s2360_s23, %s1803_s14  ;;  %s50_s27 = sadd.s32 1, %s2348_s20 }
  0x3f   : > { %s3185_s12 = smov (%p37_p1, %s36_s12), 0  ;;  %s3187_s13 = smov (!%p37_p1, %s39_s13), %s2364_s24 }
  0x40   : > { %p57_p4 = scmp.ne.s32.totalorder %s2348_s20, %s2344_s19  ;;  %p58_p6 = scmp.eq.s32.totalorder %s2368_s25, 0 }
  0x41   : > { %p41_p10 = scmp.ge.s32.totalorder %s3187_s13, 2  ;;  %s127_s7 = sadd.s32 1, %s2336_s17 }
  0x42   : > { %p2533_p11 = por %p58_p6, %p57_p4  ;;  %p1995_p13 = scmp.lt.s32.totalorder %s2368_s25, 4 }
  0x43   : > { %s3189_s13 = smov (%p41_p10, %s3187_s13), 0  ;;  %s2541_s6 = sand.u32 1, %s2348_s20  }
  0x44   : > { %3156 = sst [smem:[#allocation21_spill]] %s3189_s13  ;;  %s1812_s9 = sshll.u32 %s2523_s18, 5 }
  0x45   : > { %s1804_s10 = sshll.u32 %s3189_s13, 1  ;;  %s124_s11 = ssub.s32 %s2364_s24, %s3189_s13 }
  0x46   : > { %s46_s14 = sadd.s32 %s1804_s10, %s3185_s12  ;;  %p125_p0 = scmp.eq.s32.totalorder %s124_s11, 0 }
  0x47   : > { %s47_s2 = ssub.s32 %s2523_s18, %s46_s14  ;;  %s1810_s23 = sshll.u32 %s2541_s6, 1 }
  0x48   : > { %p48_p2 = scmp.eq.s32.totalorder %s47_s2, 0  ;;  %s2559_s29 = scalar_lea.hbm %s3123_s0, %s1812_s9 }
  0x49   : > { %s2551_s30 = scalar_select %p125_p0, %s2336_s17, %s127_s7  }
  0x4a   : > { %s2554_s15 = scalar_select %p48_p2, %s2348_s20, %s50_s27  }
  0x4b   : > { %s207_s22 = scalar_lea.vmem [#allocation2], %s1810_s23  ;;  %p2565_p3 = pnand %p1995_p13, %p2533_p11 }
  0x4c   : > { %s216_s13 = sshll.u32 %s207_s22, 4  ;;  %s223_s27 = sand.u32 1, %s2368_s25   ;;  %s2569_s13 = int_to_ptr.vmem [resolvable:$true] %s216_s13 }
  0x4d   : > { %s204_s3 = scalar_lea.sflag [#allocation3], %s2541_s6  ;;  %s2146_s4 = scalar_lea.hbm %s2559_s29, 32 }
  0x4e   : > { %p2147_p5 = scmp.ne.s32.totalorder %s2559_s29, %s2146_s4  ;;  %p2148_p7 = pneg %p2565_p3 }
  0x4f   : > { %s2151_s7 = scalar_lea.hbm %s3123_s0, 128  ;;  %p2152_p12 = scmp.lt.u32.totalorder %s2559_s29, %s3123_s0 }
  0x50   : > { %p2149_p8 = pnand %p2148_p7, %p2147_p5  ;;  %p2153_p1 = scmp.lt.u32.totalorder %s2151_s7, %s2146_s4 }
  0x51   : > { %p2155_p6 = scmp.lt.u32.totalorder %s2146_s4, %s2559_s29 }
  0x52   : > { %p2150_p9 = pneg %p2149_p8  ;;  %p2154_p4 = por %p2153_p1, %p2152_p12 }
  0x54   : > { %p2156_p10 = por %p2155_p6, %p2154_p4 }
  0x56   : > { %p2157_p11 = pnand %p2156_p10, %p2150_p9 }
  0x58   : > { %2160 = shalt.err (!%p2157_p11)
}
  0x59   : > { %s2161_s10 = scalar_lea.vmem %s2569_s13, 32  ;;  %s2373_s11 = smov [#allocation2]  }
  0x5a   : > { %p2162_p13 = scmp.ne.s32.totalorder %s2569_s13, %s2161_s10  ;;  %s2166_s14 = sshll.u32 %s2373_s11, 4  ;;  %s2167_s14 = int_to_ptr.vmem [resolvable:$false] %s2166_s14 }
  0x5b   : > { %s2168_s22 = scalar_lea.vmem %s2167_s14, 64  ;;  %p2169_p5 = scmp.lt.s32.totalorder %s2569_s13, %s2167_s14 }
  0x5c   : > { %p2164_p0 = pnand %p2162_p13, %p2148_p7  ;;  %p2170_p8 = scmp.lt.s32.totalorder %s2168_s22, %s2161_s10 }
  0x5e   : > { %p2165_p2 = pneg %p2164_p0  ;;  %p2171_p12 = por %p2170_p8, %p2169_p5 }
  0x60   : > { %p2172_p1 = pnand %p2171_p12, %p2165_p2 }
  0x62   : > { %2175 = shalt.err (!%p2172_p1)
}
  0x63   : > { %1983 = dma.hbm_to_vmem [thread:$0]  (!%p2565_p3), %s2559_s29, 32, %s2569_s13, %s204_s3  }
  0x64   : > { %s1814_s4 = sshll.u32 %s2523_s18, 4  ;;  %s226_s9 = scalar_lea.vmem [#allocation5], %s2541_s6 }
  0x65   : > { %s2602_s8 = scalar_lea.hbm %s3124_s1, %s1814_s4  ;;  %s235_s10 = sshll.u32 %s226_s9, 4  ;;  %s236_s10 = int_to_ptr.vmem [resolvable:$true] %s235_s10 }
  0x66   : > { %s224_s11 = scalar_lea.sflag [#allocation6], %s223_s27  ;;  %s2176_s14 = scalar_lea.hbm %s2602_s8, 16 }
  0x67   : > { %p2177_p9 = scmp.ne.s32.totalorder %s2602_s8, %s2176_s14  ;;  %s2181_s18 = scalar_lea.hbm %s3124_s1, 64 }
  0x68   : > { %p2182_p10 = scmp.lt.u32.totalorder %s2602_s8, %s3124_s1  ;;  %p2183_p11 = scmp.lt.u32.totalorder %s2181_s18, %s2176_s14 }
  0x69   : > { %p2179_p4 = pnand %p2177_p9, %p2148_p7  ;;  %p2185_p0 = scmp.lt.u32.totalorder %s2176_s14, %s2602_s8 }
  0x6a   : > { %p2184_p13 = por %p2183_p11, %p2182_p10 }
  0x6b   : > { %p2180_p6 = pneg %p2179_p4 }
  0x6c   : > { %p2186_p2 = por %p2185_p0, %p2184_p13 }
  0x6e   : > { %p2187_p5 = pnand %p2186_p2, %p2180_p6 }
  0x70   : > { %2190 = shalt.err (!%p2187_p5)
}
  0x71   : > { %s2191_s6 = scalar_lea.vmem %s236_s10, 16  ;;  %s2374_s27 = smov [#allocation5]  }
  0x72   : > { %p2192_p8 = scmp.ne.s32.totalorder %s236_s10, %s2191_s6  ;;  %s2196_s4 = sshll.u32 %s2374_s27, 4  ;;  %s2197_s4 = int_to_ptr.vmem [resolvable:$false] %s2196_s4 }
  0x73   : > { %s2198_s23 = scalar_lea.vmem %s2197_s4, 32  ;;  %p2199_p9 = scmp.lt.s32.totalorder %s236_s10, %s2197_s4 }
  0x74   : > { %p2194_p12 = pnand %p2192_p8, %p2148_p7  ;;  %p2200_p4 = scmp.lt.s32.totalorder %s2198_s23, %s2191_s6 }
  0x76   : > { %p2195_p1 = pneg %p2194_p12  ;;  %p2201_p10 = por %p2200_p4, %p2199_p9 }
  0x78   : > { %p2202_p11 = pnand %p2201_p10, %p2195_p1 }
  0x7a   : > { %2205 = shalt.err (!%p2202_p11)
}
  0x7b   : > { %1986 = dma.hbm_to_vmem [thread:$0]  (!%p2565_p3), %s2602_s8, 16, %s236_s10, %s224_s11  }
  0x7c   : > { %p3158_p6 = scmp.ne.s32.totalorder %s3152_s5, 0 }
  0x7d   : > { %s2629_s7 = sand.u32 (!%p3158_p6), 1, %s2344_s19   ;;  %p3159_p7 = scmp.ne.s32.totalorder (!%p3158_p6), %s3147_s28, 0 }
  0x7e   : > { %244 = sbr.rel (%p3158_p6) target bundleno = 805 (0x325), region = 32  ;;  %s1816_s9 = sshll.u32 (!%p3158_p6), %s2629_s7, 1 }
  0x7f   : > { %s247_s14 = scalar_lea.sflag (!%p3158_p6), [#allocation3], %s2629_s7  ;;  %s2633_s29 = scalar_lea.vmem (!%p3158_p6), [#allocation2], %s1816_s9 }
  0x85   : > { %2307 = dma.done.wait (%p3159_p7), %s247_s14, 32  }
  0x86   : > { %2309 = vsyncadd (%p3159_p7), %s247_s14, 4294967264  ;;  %s255_s5 = sand.u32 1, %s2465_s26   ;;  %s258_s8 = scalar_lea.vmem [#allocation5], %s2629_s7 }
  0x87   : > { %s256_s2 = scalar_lea.sflag [#allocation6], %s255_s5 }
  0x88   : > { %2311 = dma.done.wait (%p3159_p7), %s256_s2, 16  }
  0x89   : > { %2313 = vsyncadd (%p3159_p7), %s256_s2, 4294967280  ;;  %p3160_p3 = scmp.eq.s32.totalorder %s2465_s26, 0 }
  0x8b   : > { %2315 = dma.done.wait (%p3160_p3), [#allocation6], 512   ;;  %p3161_p13 = pmov %p3160_p3 }
  0x8c   : > { %s2650_s10 = sand.u32 1, %s2332_s16   ;;  %p1820_p0 = scmp.ne.s32.totalorder %s2352_s21, 0 }
  0x8d   : > { %2317 = vsyncadd (%p3161_p13), [#allocation6], 4294966784  ;;  %s1818_s11 = sshll.u32 %s2650_s10, 5  ;;  %vm307_vm0 = vcmask (!%p1820_p0), 130048   ;;  %v2375_v0 = vmov (!%p1820_p0), 0.0  }
  0x8e   : > { %s2653_s13 = scalar_lea.vmem [#allocation8], %s1818_s11  ;;  %s2655_s18 = scalar_lea.vmem [#allocation9], %s1818_s11 }
  0x8f   : > { %306 = sbr.rel (%p1820_p0) target bundleno = 150 (0x96), region = 48  ;;  %308 = vst.msk [vmem:[%s2653_s13] sm:$0xff] (!%p1820_p0), %vm307_vm0, %v2375_v0  ;;  %309 = vst.msk [vmem:[%s2653_s13 + $0x8] sm:$0xff] (!%p1820_p0), %vm307_vm0, %v2375_v0 }
  0x90   : > { %310 = vst.msk [vmem:[%s2653_s13 + $0x10] sm:$0xff] (!%p1820_p0), %vm307_vm0, %v2375_v0  ;;  %311 = vst.msk [vmem:[%s2653_s13 + $0x18] sm:$0xff] (!%p1820_p0), %vm307_vm0, %v2375_v0 }
  0x91   : > { %312 = vst.msk [vmem:[%s2655_s18] sm:$0xff] (!%p1820_p0), %vm307_vm0, %v2375_v0  ;;  %313 = vst.msk [vmem:[%s2655_s18 + $0x8] sm:$0xff] (!%p1820_p0), %vm307_vm0, %v2375_v0 }
  0x92   : > { %314 = vst.msk [vmem:[%s2655_s18 + $0x10] sm:$0xff] (!%p1820_p0), %vm307_vm0, %v2375_v0  ;;  %315 = vst.msk [vmem:[%s2655_s18 + $0x18] sm:$0xff] (!%p1820_p0), %vm307_vm0, %v2375_v0 }
  0x96 PF: > { %v318_v1 = vlaneseq  ;;  %v2668_v3 = vld [vmem:[#allocation7] sm:$0xff]   ;;  %vm1197_vm1 = vcmask 130048   ;;  %v1824_v8 = vld [vmem:[%s2633_s29 + $0x1] ss:$0 sm:$0xff]  ;;  %v2376_v31 = vmov 683565275  }
  0x97   : > { %1902 = vmatprep.mubr.msk.bf16.mxu0 %vm1197_vm1, %v2668_v3  ;;  %v2377_v33 = vmov 2475754826   ;;  %v2378_v35 = vmov 2131351028   ;;  %v2379_v37 = vmov 2102212464  }
  0x98   : > { %v2666_v2 = vshrl.u32 %v318_v1, 7  ;;  %v2380_v39 = vmov 920167782   ;;  %v2381_v48 = vmov 1326507024   ;;  %s3164_s21 = sld [smem:[#allocation17_spill]] }
  0x99   : > { %s3165_s28 = sld [smem:[#allocation19_spill]]  ;;  %s1652_s3 = sshll.u32 %s2655_s18, 4  ;;  %s3001_s3 = int_to_ptr.vmem [resolvable:$true] %s1652_s3 }
  0x9a   : > { %v320_v4 = vadd.s32 8, %v2666_v2  ;;  %v321_v5 = vcvt.s32.f32 %v2666_v2  ;;  %s3166_s27 = sld [smem:[#allocation24_spill]]  ;;  %s1623_s23 = scalar_lea.sflag [#allocation10], %s2650_s10 }
  0x9b   : > { %s2206_s7 = scalar_lea.vmem %s3001_s3, 512  ;;  %s2382_s9 = smov [#allocation9]  }
  0x9c   : > { %v322_v6 = vcvt.s32.f32 %v320_v4  ;;  %v1821_v7 = vadd.f32 -8.0, %v321_v5  ;;  %p2207_p2 = scmp.ne.s32.totalorder %s3001_s3, %s2206_s7  ;;  %s2210_s14 = sshll.u32 %s2382_s9, 4  ;;  %s2211_s14 = int_to_ptr.vmem [resolvable:$false] %s2210_s14 }
  0x9d   : > { %p2213_p1 = scmp.lt.s32.totalorder %s3001_s3, %s2211_s14 }
  0x9e   : > { %v1822_v9 = vadd.f32 -8.0, %v322_v6  ;;  %v2675_v10 = vmul.f32 6.2831855, %v1821_v7  ;;  %s1878_s26 = sshll.u32 %s3164_s21, 9 }
  0x9f   : > { %p3167_p5 = scmp.ne.s32.totalorder %s3165_s28, 0 }
  0xa0   : > { %v2677_v11 = vmul.f32 6.2831855, %v1822_v9  ;;  %v2680_v12 = vmul.f32 %v1824_v8, %v2675_v10  ;;  %s2999_s4 = scalar_lea.hbm %s3166_s27, %s1878_s26 }
  0xa1   : > { %p2208_p8 = pnand %p2207_p2, %p3167_p5 }
  0xa2   : > { %v2683_v13 = vmul.f32 %v1824_v8, %v2677_v11  ;;  %v756_v14 = vand.u32 2139095040, %v2680_v12  ;;  %v753_v15 = vand.u32 2147483647, %v2680_v12  ;;  %vm755_vm0 = vcmp.lt.s32.totalorder %v2680_v12, 0 }
  0xa3   : > { %p2209_p12 = pneg %p2208_p8 }
  0xa4   : > { %v757_v16 = vshrl.u32 %v756_v14, 23  ;;  %v859_v17 = vand.u32 2139095040, %v2683_v13  ;;  %v760_v20 = vand.u32 8388607, %v753_v15  ;;  %v856_v21 = vand.u32 2147483647, %v2683_v13 }
  0xa6   : > { %v1841_v18 = vadd.s32 4294967169, %v757_v16  ;;  %v860_v19 = vshrl.u32 %v859_v17, 23  ;;  %v761_v25 = vor.u32 8388608, %v760_v20  ;;  %v863_v27 = vand.u32 8388607, %v856_v21 }
  0xa8   : > { %v763_v22 = vadd.s32 1, %v1841_v18  ;;  %v1845_v23 = vadd.s32 4294967169, %v860_v19  ;;  %v2698_v41 = vshll.u32 %v761_v25, 8  ;;  %v864_v42 = vor.u32 8388608, %v863_v27 }
  0xaa   : > { %vm764_vm2 = vcmp.gt.s32.totalorder %v763_v22, 0  ;;  %v866_v24 = vadd.s32 1, %v1845_v23  ;;  %v904_v8 = vshll.u32 %v864_v42, 8 }
  0xab   : > { %v765_v26 = vsel %vm764_vm2, %v763_v22, 0  ;;  %vm2753_vm2 = vcmp.le.f32.partialorder %v753_v15, 0.7853982 }
  0xac   : > { %v767_v28 = vand.u32 31, %v765_v26  ;;  %v766_v29 = vshrl.u32 %v765_v26, 5  ;;  %vm867_vm3 = vcmp.gt.s32.totalorder %v866_v24, 0 }
  0xad   : > { %v868_v50 = vsel %vm867_vm3, %v866_v24, 0  ;;  %vm858_vm3 = vcmp.lt.s32.totalorder %v2683_v13, 0 }
  0xae   : > { %v768_v30 = vsub.s32 32, %v767_v28  ;;  %v770_v32 = vshll.u32 %v2376_v31, %v767_v28  ;;  %v773_v34 = vshll.u32 %v2377_v33, %v767_v28  ;;  %v776_v36 = vshll.u32 %v2378_v35, %v767_v28 }
  0xaf   : > { %v779_v38 = vshll.u32 %v2379_v37, %v767_v28  ;;  %v782_v40 = vshll.u32 %v2380_v39, %v767_v28  ;;  %vm785_vm4 = vcmp.lt.s32.totalorder %v766_v29, 1  ;;  %vm786_vm5 = vcmp.lt.s32.totalorder %v766_v29, 2 }
  0xb0   : > { %v769_v43 = vshrl.u32 %v2376_v31, %v768_v30  ;;  %v771_v44 = vshrl.u32 %v2377_v33, %v768_v30  ;;  %v774_v45 = vshrl.u32 %v2378_v35, %v768_v30  ;;  %v777_v46 = vshrl.u32 %v2379_v37, %v768_v30 }
  0xb1   : > { %v780_v47 = vshrl.u32 %v2380_v39, %v768_v30  ;;  %v783_v49 = vshrl.u32 %v2381_v48, %v768_v30  ;;  %vm787_vm6 = vcmp.lt.s32.totalorder %v766_v29, 3  ;;  %vm788_vm7 = vcmp.lt.s32.totalorder %v766_v29, 4 }
  0xb2   : > { %v772_v51 = vor.u32 %v771_v44, %v770_v32  ;;  %v775_v52 = vor.u32 %v774_v45, %v773_v34  ;;  %v778_v53 = vor.u32 %v777_v46, %v776_v36  ;;  %v869_v1 = vshrl.u32 %v868_v50, 5 }
  0xb3   : > { %v781_v54 = vor.u32 %v780_v47, %v779_v38  ;;  %v784_v55 = vor.u32 %v783_v49, %v782_v40  ;;  %v870_v4 = vand.u32 31, %v868_v50 }
  0xb4   : > { %v789_v56 = vsel %vm785_vm4, %v769_v43, %v772_v51  ;;  %v790_v57 = vsel %vm788_vm7, %v778_v53, 2102212464  ;;  %v793_v58 = vsel %vm785_vm4, %v772_v51, %v775_v52  ;;  %v797_v59 = vsel %vm785_vm4, %v775_v52, %v778_v53 }
  0xb5   : > { %v791_v60 = vsel %vm787_vm6, %v775_v52, %v790_v57  ;;  %v794_v61 = vsel %vm788_vm7, %v781_v54, 920167782  ;;  %v798_v62 = vsel %vm788_vm7, %v784_v55, 1326507024  ;;  %v871_v18 = vsub.s32 32, %v870_v4 }
  0xb6   : > { %v795_v63 = vsel %vm787_vm6, %v778_v53, %v794_v61  ;;  %v799_v0 = vsel %vm787_vm6, %v781_v54, %v798_v62  ;;  %v792_v5 = vsel %vm786_vm5, %v789_v56, %v791_v60  ;;  %v873_v19 = vshll.u32 %v2376_v31, %v870_v4 }
  0xb7   : > { %v796_v6 = vsel %vm786_vm5, %v793_v58, %v795_v63  ;;  %v800_v7 = vsel %vm786_vm5, %v797_v59, %v799_v0  ;;  %v876_v20 = vshll.u32 %v2377_v33, %v870_v4  ;;  %v879_v22 = vshll.u32 %v2378_v35, %v870_v4 }
  0xb8   : > { %v2711_v9 = vmul.u32.u64.low %v2698_v41, %v800_v7  ;;  %v2712_v14 = vmul.u32.u64.high %v2698_v41, %v800_v7, %v2711_v9  ;;  %v2715_v16 = vmul.u32.u64.low %v2698_v41, %v796_v6  ;;  %v2716_v17 = vmul.u32.u64.high %v2698_v41, %v796_v6, %v2715_v16 }
  0xb9   : > { %v808_v23 = vmul.u32 %v2698_v41, %v792_v5  ;;  %v882_v24 = vshll.u32 %v2379_v37, %v870_v4  ;;  %v885_v25 = vshll.u32 %v2380_v39, %v870_v4  ;;  %vm888_vm8 = vcmp.lt.s32.totalorder %v869_v1, 1 }
  0xba   : > { %v872_v26 = vshrl.u32 %v2376_v31, %v871_v18  ;;  %v874_v27 = vshrl.u32 %v2377_v33, %v871_v18  ;;  %v877_v28 = vshrl.u32 %v2378_v35, %v871_v18  ;;  %v880_v29 = vshrl.u32 %v2379_v37, %v871_v18 }
  0xbb   : > { %vm810_vm9 = vc.u32 %v2712_v14, %v2715_v16  ;;  %v811_v30 = vadd.s32 1, %v2716_v17  ;;  %v883_v32 = vshrl.u32 %v2380_v39, %v871_v18  ;;  %vm889_vm10 = vcmp.lt.s32.totalorder %v869_v1, 2 }
  0xbc   : > { %v875_v34 = vor.u32 %v874_v27, %v873_v19  ;;  %v878_v36 = vor.u32 %v877_v28, %v876_v20  ;;  %v881_v38 = vor.u32 %v880_v29, %v879_v22  ;;  %v886_v40 = vshrl.u32 %v2381_v48, %v871_v18 }
  0xbd   : > { %v812_v41 = vsel %vm810_vm9, %v811_v30, %v2716_v17  ;;  %v884_v42 = vor.u32 %v883_v32, %v882_v24  ;;  %vm890_vm11 = vcmp.lt.s32.totalorder %v869_v1, 3  ;;  %vm891_vm12 = vcmp.lt.s32.totalorder %v869_v1, 4 }
  0xbe   : > { %v813_v43 = vadd.s32 %v812_v41, %v808_v23  ;;  %v887_v44 = vor.u32 %v886_v40, %v885_v25  ;;  %v892_v45 = vsel %vm888_vm8, %v872_v26, %v875_v34  ;;  %v893_v46 = vsel %vm891_vm12, %v881_v38, 2102212464 }
  0xbf   : > { %v894_v47 = vsel %vm890_vm11, %v878_v36, %v893_v46  ;;  %v896_v49 = vsel %vm888_vm8, %v875_v34, %v878_v36  ;;  %v897_v50 = vsel %vm891_vm12, %v884_v42, 920167782  ;;  %v900_v51 = vsel %vm888_vm8, %v878_v36, %v881_v38 }
  0xc0   : > { %v814_v52 = vadd.s32 536870912, %v813_v43  ;;  %v898_v53 = vsel %vm890_vm11, %v881_v38, %v897_v50  ;;  %v901_v54 = vsel %vm891_vm12, %v887_v44, 1326507024  ;;  %v895_v55 = vsel %vm889_vm10, %v892_v45, %v894_v47 }
  0xc1   : > { %v899_v56 = vsel %vm889_vm10, %v896_v49, %v898_v53  ;;  %v902_v57 = vsel %vm890_vm11, %v884_v42, %v901_v54  ;;  %v911_v4 = vmul.u32 %v904_v8, %v895_v55  ;;  %v809_v24 = vadd.s32 %v2715_v16, %v2712_v14 }
  0xc2   : > { %v815_v58 = vshrl.u32 %v814_v52, 30  ;;  %v903_v59 = vsel %vm889_vm10, %v900_v51, %v902_v57  ;;  %v2739_v60 = vmul.u32.u64.low %v904_v8, %v899_v56  ;;  %v2740_v61 = vmul.u32.u64.high %v904_v8, %v899_v56, %v2739_v60 }
  0xc3   : > { %v2742_v62 = vmul.u32.u64.low %v904_v8, %v903_v59  ;;  %v2743_v63 = vmul.u32.u64.high %v904_v8, %v903_v59, %v2742_v62  ;;  %vm857_vm4 = vcmp.le.f32.partialorder %v856_v21, 0.7853982  ;;  %vm845_vm11 = vweird.f32 %v2680_v12 }
  0xc4   : > { %v816_v0 = vshll.u32 %v815_v58, 30  ;;  %v914_v6 = vadd.s32 1, %v2740_v61  ;;  %v839_v59 = vsub.s32 4, %v815_v58 }
  0xc5   : > { %vm913_vm13 = vc.u32 %v2743_v63, %v2739_v60  ;;  %v912_v45 = vadd.s32 %v2739_v60, %v2743_v63 }
  0xc6   : > { %v817_v5 = vsub.s32 %v813_v43, %v816_v0  ;;  %v915_v9 = vsel %vm913_vm13, %v914_v6, %v2740_v61  ;;  %v840_v62 = vsel %vm755_vm0, %v839_v59, %v815_v58 }
  0xc7   : > { %v916_v17 = vadd.s32 %v915_v9, %v911_v4  ;;  %v842_v4 = vsel %vm2753_vm2, 0, %v840_v62 }
  0xc8   : > { %v819_v7 = vsub.s32 0, %v817_v5  ;;  %v1052_v6 = vadd.s32 3, %v842_v4  ;;  %v846_v58 = vand.u32 3, %v842_v4 }
  0xc9   : > { %v917_v1 = vadd.s32 536870912, %v916_v17 }
  0xca   : > { %v1842_v18 = vmin.u32 %v819_v7, %v817_v5  ;;  %vm848_vm5 = vcmp.eq.s32.totalorder %v846_v58, 0  ;;  %vm851_vm6 = vcmp.eq.s32.totalorder %v846_v58, 2  ;;  %vm847_vm9 = vcmp.lt.s32.totalorder %v846_v58, 2 }
  0xcb   : > { %v918_v20 = vshrl.u32 %v917_v1, 30 }
  0xcc   : > { %v821_v19 = vclz %v1842_v18 }
  0xcd   : > { %v919_v23 = vshll.u32 %v918_v20, 30  ;;  %v942_v0 = vsub.s32 4, %v918_v20 }
  0xce   : > { %v1843_v22 = vadd.s32 4294967294, %v821_v19 }
  0xcf   : > { %v920_v8 = vsub.s32 %v916_v17, %v919_v23  ;;  %v943_v9 = vsel %vm858_vm3, %v942_v0, %v918_v20 }
  0xd0   : > { %vm1844_vm14 = vcmp.lt.s32.totalorder %v1843_v22, 0  ;;  %v945_v19 = vsel %vm857_vm4, 0, %v943_v9 }
  0xd1   : > { %v824_v25 = vsel %vm1844_vm14, 0, %v1843_v22  ;;  %v922_v29 = vsub.s32 0, %v920_v8  ;;  %v1053_v22 = vand.u32 3, %v1052_v6  ;;  %v1156_v23 = vadd.s32 3, %v945_v19 }
  0xd2   : > { %v825_v26 = vsub.s32 32, %v824_v25  ;;  %v826_v27 = vshll.u32 %v817_v5, %v824_v25  ;;  %v829_v28 = vsub.s32 4294967266, %v824_v25  ;;  %v949_v21 = vand.u32 3, %v945_v19 }
  0xd3   : > { %v1846_v34 = vmin.u32 %v922_v29, %v920_v8  ;;  %vm1055_vm7 = vcmp.eq.s32.totalorder %v1053_v22, 0  ;;  %vm1058_vm8 = vcmp.eq.s32.totalorder %v1053_v22, 2  ;;  %vm1054_vm10 = vcmp.lt.s32.totalorder %v1053_v22, 2 }
  0xd4   : > { %v827_v30 = vshrl.u32 %v809_v24, %v825_v26  ;;  %v830_v32 = vadd.s32 127, %v829_v28  ;;  %vm951_vm12 = vcmp.eq.s32.totalorder %v949_v21, 0  ;;  %vm954_vm13 = vcmp.eq.s32.totalorder %v949_v21, 2 }
  0xd5   : > { %v924_v40 = vclz %v1846_v34 }
  0xd6   : > { %v828_v36 = vor.u32 %v827_v30, %v826_v27  ;;  %v831_v38 = vshll.u32 %v830_v32, 23 }
  0xd7   : > { %v1847_v43 = vadd.s32 4294967294, %v924_v40 }
  0xd8   : > { %v832_v41 = vor.u32 4788187, %v831_v38  ;;  %v835_v42 = vcvt.s32.f32 %v828_v36 }
  0xd9   : > { %vm1848_vm15 = vcmp.lt.s32.totalorder %v1847_v43, 0 }
  0xda   : > { %v833_v44 = vand.u32 2147483647, %v832_v41  ;;  %v927_v16 = vsel %vm1848_vm15, 0, %v1847_v43 }
  0xdb   : > { %v928_v46 = vsub.s32 32, %v927_v16  ;;  %v929_v47 = vshll.u32 %v920_v8, %v927_v16  ;;  %v932_v49 = vsub.s32 4294967266, %v927_v16  ;;  %v1157_v8 = vand.u32 3, %v1156_v23 }
  0xdc   : > { %v836_v14 = vmul.f32 %v835_v42, %v833_v44 }
  0xdd   : > { %v930_v52 = vshrl.u32 %v912_v45, %v928_v46  ;;  %v933_v53 = vadd.s32 127, %v932_v49  ;;  %vm1162_vm14 = vcmp.eq.s32.totalorder %v1157_v8, 2  ;;  %vm1159_vm15 = vcmp.eq.s32.totalorder %v1157_v8, 0 }
  0xde   : > { %v837_v51 = vxor.u32 2147483648, %v836_v14 }
  0xdf   : > { %v931_v56 = vor.u32 %v930_v52, %v929_v47  ;;  %v934_v57 = vshll.u32 %v933_v53, 23  ;;  %v1823_v52 = vld [vmem:[%s2633_s29] ss:$0 sm:$0xff]  ;;  %s2212_s29 = scalar_lea.vmem %s2211_s14, 1024 }
  0xe0   : > { %v838_v54 = vsel %vm755_vm0, %v837_v51, %v836_v14  ;;  %vm950_vm0 = vcmp.lt.s32.totalorder %v949_v21, 2  ;;  %v2099_v51 = vld [vmem:[#allocation7 + $0x8] sm:$0xff]   ;;  %v2791_v53 = vmul.f32 %v1823_v52, %v2675_v10  ;;  %p2214_p9 = scmp.lt.s32.totalorder %s2212_s29, %s2206_s7 }
  0xe1   : > { %v841_v55 = vsel %vm2753_vm2, %v2680_v12, %v838_v54  ;;  %v935_v60 = vor.u32 4788187, %v934_v57  ;;  %v938_v61 = vcvt.s32.f32 %v931_v56  ;;  %vm1158_vm2 = vcmp.lt.s32.totalorder %v1157_v8, 2  ;;  %v2101_v12 = vld [vmem:[#allocation7 + $0x18] sm:$0xff]  }
  0xe2   : > { %2102 = vcosq.f32 %v841_v55  ;;  %v2794_v54 = vmul.f32 %v1823_v52, %v2677_v11  ;;  %p2215_p4 = por %p2214_p9, %p2213_p1 }
  0xe3   : > { %2104 = vsinq.f32 %v841_v55  ;;  %v936_v15 = vand.u32 2147483647, %v935_v60  ;;  %v342_v55 = vand.u32 2139095040, %v2791_v53 }
  0xe4   : > { %v445_v56 = vand.u32 2139095040, %v2794_v54  ;;  %p2216_p10 = pnand %p2215_p4, %p2209_p12 }
  0xe5   : > { %v939_v63 = vmul.f32 %v938_v61, %v936_v15  ;;  %v343_v57 = vshrl.u32 %v342_v55, 23 }
  0xe6   : > { %v446_v59 = vshrl.u32 %v445_v56, 23 }
  0xe7   : > { %v940_v5 = vxor.u32 2147483648, %v939_v63 }
  0xe8   : > { %v1829_v60 = vadd.s32 4294967169, %v446_v59 }
  0xe9   : > { %v941_v7 = vsel %vm858_vm3, %v940_v5, %v939_v63  ;;  %vm948_vm3 = vweird.f32 %v2683_v13  ;;  %v339_v5 = vand.u32 2147483647, %v2791_v53 }
  0xea   : > { %v944_v17 = vsel %vm857_vm4, %v2683_v13, %v941_v7  ;;  %v2100_v13 = vld [vmem:[#allocation7 + $0x10] sm:$0xff]   ;;  %v452_v15 = vadd.s32 1, %v1829_v60 }
  0xeb   : > { %2106 = vcosq.f32 %v944_v17  ;;  %v346_v19 = vand.u32 8388607, %v339_v5 }
  0xec   : > { %v2103_v18 = vpop.eup %2102  ;;  %2108 = vsinq.f32 %v944_v17 }
  0xed   : > { %v2105_v1 = vpop.eup %2104  ;;  %v852_v25 = vxor.u32 2147483648, %v2103_v18 }
  0xee   : > { %v849_v24 = vxor.u32 2147483648, %v2105_v1 }
  0xef   : > { %v853_v26 = vsel %vm851_vm6, %v852_v25, %v2105_v1  ;;  %v1060_v28 = vsel %vm1058_vm8, %v852_v25, %v2105_v1 }
  0xf0   : > { %v850_v20 = vsel %vm848_vm5, %v2103_v18, %v849_v24  ;;  %v1057_v27 = vsel %vm1055_vm7, %v2103_v18, %v849_v24  ;;  %vm453_vm5 = vcmp.gt.s32.totalorder %v452_v15, 0 }
  0xf1   : > { %v854_v32 = vsel %vm847_vm9, %v850_v20, %v853_v26  ;;  %v1061_v36 = vsel %vm1054_vm10, %v1057_v27, %v1060_v28  ;;  %v454_v63 = vsel %vm453_vm5, %v452_v15, 0  ;;  %v442_v27 = vand.u32 2147483647, %v2794_v54 }
  0xf2   : > { %v855_v42 = vsel %vm845_vm11, nan, %v854_v32  ;;  %v1062_v44 = vsel %vm845_vm11, nan, %v1061_v36  ;;  %v456_v10 = vand.u32 31, %v454_v63  ;;  %v2810_v18 = vshrl.u32 %v454_v63, 5 }
  0xf3   : > { %vm340_vm5 = vcmp.le.f32.partialorder %v339_v5, 0.7853982 }
  0xf4   : > { %v2800_v11 = vsub.s32 32, %v456_v10  ;;  %v468_v8 = vshll.u32 %v2379_v37, %v456_v10  ;;  %v471_v28 = vshll.u32 %v2380_v39, %v456_v10  ;;  %vm477_vm7 = vcmp.lt.s32.totalorder %v2810_v18, 4 }
  0xf5   : > { %v2107_v29 = vpop.eup %2106  ;;  %vm474_vm11 = vcmp.lt.s32.totalorder %v2810_v18, 1 }
  0xf6   : > { %v2109_v30 = vpop.eup %2108  ;;  %v955_v34 = vxor.u32 2147483648, %v2107_v29  ;;  %v472_v1 = vshrl.u32 %v2381_v48, %v2800_v11  ;;  %v460_v32 = vshrl.u32 %v2377_v33, %v2800_v11  ;;  %v463_v36 = vshrl.u32 %v2378_v35, %v2800_v11 }
  0xf7   : > { %v952_v38 = vxor.u32 2147483648, %v2109_v30 }
  0xf8   : > { %v956_v40 = vsel %vm954_vm13, %v955_v34, %v2109_v30  ;;  %v1164_v41 = vsel %vm1162_vm14, %v955_v34, %v2109_v30  ;;  %v459_v30 = vshll.u32 %v2376_v31, %v456_v10  ;;  %v462_v34 = vshll.u32 %v2377_v33, %v456_v10 }
  0xf9   : > { %v953_v43 = vsel %vm951_vm12, %v2107_v29, %v952_v38  ;;  %v1161_v45 = vsel %vm1159_vm15, %v2107_v29, %v952_v38  ;;  %v465_v38 = vshll.u32 %v2378_v35, %v456_v10  ;;  %vm476_vm12 = vcmp.lt.s32.totalorder %v2810_v18, 3 }
  0xfa   : > { %v957_v14 = vsel %vm950_vm0, %v953_v43, %v956_v40  ;;  %v1165_v16 = vsel %vm1158_vm2, %v1161_v45, %v1164_v41  ;;  %v466_v40 = vshrl.u32 %v2379_v37, %v2800_v11  ;;  %v473_v45 = vor.u32 %v472_v1, %v471_v28 }
  0xfb   : > { %v958_v46 = vsel %vm948_vm3, nan, %v957_v14  ;;  %v1166_v47 = vsel %vm948_vm3, nan, %v1165_v16  ;;  %v347_v14 = vor.u32 8388608, %v346_v19  ;;  %v464_v16 = vor.u32 %v463_v36, %v462_v34 }
  0xfc   : > { %v1167_v49 = vpack.c.bf16 %v958_v46, %v855_v42  ;;  %v2776_v50 = vpack.c.bf16 %v1166_v47, %v1062_v44  ;;  %v449_v44 = vand.u32 8388607, %v442_v27  ;;  %v467_v46 = vor.u32 %v466_v40, %v465_v38 }
  0xfd   : > { %v387_v56 = vshll.u32 %v347_v14, 8  ;;  %vm475_vm13 = vcmp.lt.s32.totalorder %v2810_v18, 2  ;;  %vm341_vm3 = vcmp.lt.s32.totalorder %v2791_v53, 0 }
  0xfe   : > { %1900 = vmatprep.subr.bf16.mxu0 %v1167_v49  ;;  %1920 = vmatprep.subr.bf16.mxu1 %v1167_v49  ;;  %v486_v60 = vsel %vm474_vm11, %v464_v16, %v467_v46 }
  0xff   : > { %1901 = vmatpush3.bf16.msra.mxu0 %v1167_v49  ;;  %1921 = vmatpush3.bf16.xpose.msra.mxu1 %v1167_v49 }
 0x100   : > { %1910 = vmatprep.subr.bf16.mxu0 %v2776_v50  ;;  %1930 = vmatprep.subr.bf16.mxu1 %v2776_v50 }
 0x102   : > { %1903 = vmatmul.mubr.msk.bf16.vlgmr.msra.gmra.mrb[0].mxu0 %vm1197_vm1, %v2099_v51 }
 0x103   : > { %1911 = vmatpush3.bf16.msra.mxu0 %v2776_v50  ;;  %1906 = vmatprep.mubr.msk.bf16.mxu0 %vm1197_vm1, %v2100_v13 }
 0x10a   : > { %1907 = vmatmul.mubr.msk.bf16.gmra.mrb[4].mxu0 %vm1197_vm1, %v2101_v12 }
 0x10b   : > { %1912 = vmatprep.mubr.msk.bf16.mxu0 %vm1197_vm1, %v2668_v3  ;;  %v1825_v3 = vadd.s32 4294967169, %v343_v57 }
 0x10d   : > { %v349_v61 = vadd.s32 1, %v1825_v3 }
 0x10f   : > { %vm350_vm4 = vcmp.gt.s32.totalorder %v349_v61, 0 }
 0x110   : > { %v351_v62 = vsel %vm350_vm4, %v349_v61, 0  ;;  %vm444_vm4 = vcmp.lt.s32.totalorder %v2794_v54, 0 }
 0x111   : > { %v353_v0 = vand.u32 31, %v351_v62  ;;  %v2803_v6 = vshrl.u32 %v351_v62, 5 }
 0x112   : > { %1913 = vmatmul.mubr.msk.bf16.vlgmr.msra.gmra.mrb[8].mxu0 %vm1197_vm1, %v2099_v51 }
 0x113   : > { %1916 = vmatprep.mubr.msk.bf16.mxu0 %vm1197_vm1, %v2100_v13  ;;  %v2798_v4 = vsub.s32 32, %v353_v0  ;;  %v365_v7 = vshll.u32 %v2379_v37, %v353_v0  ;;  %v368_v58 = vshll.u32 %v2380_v39, %v353_v0  ;;  %v356_v22 = vshll.u32 %v2376_v31, %v353_v0 }
 0x114   : > { %v359_v24 = vshll.u32 %v2377_v33, %v353_v0  ;;  %v362_v21 = vshll.u32 %v2378_v35, %v353_v0  ;;  %vm374_vm6 = vcmp.lt.s32.totalorder %v2803_v6, 4  ;;  %vm371_vm8 = vcmp.lt.s32.totalorder %v2803_v6, 1 }
 0x115   : > { %v366_v9 = vshrl.u32 %v2380_v39, %v2798_v4  ;;  %v369_v17 = vshrl.u32 %v2381_v48, %v2798_v4  ;;  %v357_v23 = vshrl.u32 %v2377_v33, %v2798_v4  ;;  %v360_v25 = vshrl.u32 %v2378_v35, %v2798_v4 }
 0x116   : > { %v469_v48 = vshrl.u32 %v2380_v39, %v2800_v11  ;;  %v363_v20 = vshrl.u32 %v2379_v37, %v2798_v4  ;;  %vm373_vm9 = vcmp.lt.s32.totalorder %v2803_v6, 3  ;;  %v461_v37 = vor.u32 %v460_v32, %v459_v30 }
 0x117   : > { %v367_v26 = vor.u32 %v366_v9, %v365_v7  ;;  %v370_v29 = vor.u32 %v369_v17, %v368_v58  ;;  %v358_v41 = vor.u32 %v357_v23, %v356_v22  ;;  %v361_v39 = vor.u32 %v360_v25, %v359_v24 }
 0x118   : > { %v470_v42 = vor.u32 %v469_v48, %v468_v8  ;;  %v364_v43 = vor.u32 %v363_v20, %v362_v21  ;;  %vm372_vm10 = vcmp.lt.s32.totalorder %v2803_v6, 2  ;;  %v450_v13 = vor.u32 8388608, %v449_v44 }
 0x119   : > { %v380_v33 = vsel %vm374_vm6, %v367_v26, 920167782  ;;  %v384_v35 = vsel %vm374_vm6, %v370_v29, 1326507024  ;;  %v379_v49 = vsel %vm371_vm8, %v358_v41, %v361_v39  ;;  %v482_v57 = vsel %vm474_vm11, %v461_v37, %v464_v16 }
 0x11a   : > { %1917 = vmatmul.mubr.msk.bf16.gmra.mrb[0].mxu0 %vm1197_vm1, %v2101_v12  ;;  %v483_v47 = vsel %vm477_vm7, %v470_v42, 920167782  ;;  %v381_v51 = vsel %vm373_vm9, %v364_v43, %v380_v33  ;;  %v487_v12 = vsel %vm477_vm7, %v473_v45, 1326507024  ;;  %v383_v52 = vsel %vm371_vm8, %v361_v39, %v364_v43 }
 0x11b   : > { %v385_v55 = vsel %vm373_vm9, %v367_v26, %v384_v35  ;;  %v484_v59 = vsel %vm476_vm12, %v467_v46, %v483_v47  ;;  %v382_v3 = vsel %vm372_vm10, %v379_v49, %v381_v51  ;;  %v488_v61 = vsel %vm476_vm12, %v470_v42, %v487_v12 }
 0x11c   : > { %v386_v15 = vsel %vm372_vm10, %v383_v52, %v385_v55  ;;  %v490_v62 = vshll.u32 %v450_v13, 8  ;;  %v485_v63 = vsel %vm475_vm13, %v482_v57, %v484_v59  ;;  %v489_v7 = vsel %vm475_vm13, %v486_v60, %v488_v61 }
 0x11d   : > { %v2880_v0 = vmul.u32.u64.low %v387_v56, %v382_v3  ;;  %v2881_v10 = vmul.u32.u64.high %v387_v56, %v382_v3, %v2880_v0  ;;  %v355_v9 = vshrl.u32 %v2376_v31, %v2798_v4  ;;  %v376_v58 = vsel %vm374_vm6, %v364_v43, 2102212464 }
 0x11e   : > { %v2887_v17 = vmul.u32.u64.low %v387_v56, %v386_v15  ;;  %v2888_v1 = vmul.u32.u64.high %v387_v56, %v386_v15, %v2887_v17  ;;  %v2892_v19 = vmul.u32.u64.low %v490_v62, %v485_v63  ;;  %v2893_v22 = vmul.u32.u64.high %v490_v62, %v485_v63, %v2892_v19 }
 0x11f   : > { %v458_v23 = vshrl.u32 %v2376_v31, %v2800_v11  ;;  %v2897_v24 = vmul.u32.u64.low %v490_v62, %v489_v7  ;;  %v2898_v25 = vmul.u32.u64.high %v490_v62, %v489_v7, %v2897_v24  ;;  %v479_v21 = vsel %vm477_vm7, %v467_v46, 2102212464 }
 0x120   : > { %v375_v4 = vsel %vm371_vm8, %v355_v9, %v358_v41  ;;  %v377_v8 = vsel %vm373_vm9, %v361_v39, %v376_v58  ;;  %v480_v20 = vsel %vm476_vm12, %v464_v16, %v479_v21  ;;  %v397_v11 = vadd.s32 1, %v2881_v10 }
 0x121   : > { %v478_v48 = vsel %vm474_vm11, %v458_v23, %v461_v37  ;;  %v378_v31 = vsel %vm372_vm10, %v375_v4, %v377_v8  ;;  %vm396_vm14 = vc.u32 %v2888_v1, %v2880_v0  ;;  %v500_v28 = vadd.s32 1, %v2893_v22 }
 0x122   : > { %v481_v26 = vsel %vm475_vm13, %v478_v48, %v480_v20  ;;  %v394_v29 = vmul.u32 %v387_v56, %v378_v31  ;;  %vm499_vm15 = vc.u32 %v2898_v25, %v2892_v19  ;;  %v398_v30 = vsel %vm396_vm14, %v397_v11, %v2881_v10 }
 0x123   : > { %v497_v32 = vmul.u32 %v490_v62, %v481_v26  ;;  %v501_v34 = vsel %vm499_vm15, %v500_v28, %v2893_v22  ;;  %v395_v52 = vadd.s32 %v2880_v0, %v2888_v1  ;;  %v498_v57 = vadd.s32 %v2892_v19, %v2898_v25 }
 0x124   : > { %v399_v36 = vadd.s32 %v398_v30, %v394_v29  ;;  %vm443_vm6 = vcmp.le.f32.partialorder %v442_v27, 0.7853982 }
 0x125   : > { %v502_v6 = vadd.s32 %v501_v34, %v497_v32 }
 0x126   : > { %v400_v38 = vadd.s32 536870912, %v399_v36 }
 0x127   : > { %v503_v40 = vadd.s32 536870912, %v502_v6 }
 0x128   : > { %v401_v41 = vshrl.u32 %v400_v38, 30 }
 0x129   : > { %v504_v39 = vshrl.u32 %v503_v40, 30 }
 0x12a   : > { %v402_v42 = vshll.u32 %v401_v41, 30  ;;  %v425_v48 = vsub.s32 4, %v401_v41 }
 0x12b   : > { %v505_v43 = vshll.u32 %v504_v39, 30  ;;  %v528_v31 = vsub.s32 4, %v504_v39 }
 0x12c   : > { %v403_v18 = vsub.s32 %v399_v36, %v402_v42  ;;  %v426_v26 = vsel %vm341_vm3, %v425_v48, %v401_v41 }
 0x12d   : > { %v506_v44 = vsub.s32 %v502_v6, %v505_v43  ;;  %v529_v28 = vsel %vm444_vm4, %v528_v31, %v504_v39  ;;  %v428_v29 = vsel %vm340_vm5, 0, %v426_v26 }
 0x12e   : > { %v405_v45 = vsub.s32 0, %v403_v18  ;;  %v531_v30 = vsel %vm443_vm6, 0, %v529_v28  ;;  %v638_v5 = vadd.s32 3, %v428_v29  ;;  %v432_v27 = vand.u32 3, %v428_v29 }
 0x12f   : > { %v508_v14 = vsub.s32 0, %v506_v44  ;;  %v742_v32 = vadd.s32 3, %v531_v30  ;;  %v535_v42 = vand.u32 3, %v531_v30 }
 0x130   : > { %v1826_v33 = vmin.u32 %v405_v45, %v403_v18  ;;  %v639_v6 = vand.u32 3, %v638_v5  ;;  %vm434_vm7 = vcmp.eq.s32.totalorder %v432_v27, 0  ;;  %vm437_vm8 = vcmp.eq.s32.totalorder %v432_v27, 2 }
 0x131   : > { %v1830_v35 = vmin.u32 %v508_v14, %v506_v44  ;;  %v743_v43 = vand.u32 3, %v742_v32  ;;  %vm433_vm11 = vcmp.lt.s32.totalorder %v432_v27, 2  ;;  %vm537_vm13 = vcmp.eq.s32.totalorder %v535_v42, 0 }
 0x132   : > { %v407_v37 = vclz %v1826_v33  ;;  %vm641_vm9 = vcmp.eq.s32.totalorder %v639_v6, 0  ;;  %vm644_vm10 = vcmp.eq.s32.totalorder %v639_v6, 2  ;;  %vm640_vm12 = vcmp.lt.s32.totalorder %v639_v6, 2 }
 0x133   : > { %v510_v16 = vclz %v1830_v35  ;;  %vm540_vm14 = vcmp.eq.s32.totalorder %v535_v42, 2  ;;  %vm745_vm15 = vcmp.eq.s32.totalorder %v743_v43, 0 }
 0x134   : > { %v1827_v46 = vadd.s32 4294967294, %v407_v37 }
 0x135   : > { %v1831_v47 = vadd.s32 4294967294, %v510_v16 }
 0x136   : > { %vm1828_vm0 = vcmp.lt.s32.totalorder %v1827_v46, 0 }
 0x137   : > { %vm1832_vm2 = vcmp.lt.s32.totalorder %v1831_v47, 0  ;;  %v410_v49 = vsel %vm1828_vm0, 0, %v1827_v46  ;;  %vm748_vm0 = vcmp.eq.s32.totalorder %v743_v43, 2 }
 0x138   : > { %v513_v51 = vsel %vm1832_vm2, 0, %v1831_v47  ;;  %v415_v13 = vsub.s32 4294967266, %v410_v49  ;;  %v411_v55 = vsub.s32 32, %v410_v49  ;;  %v412_v60 = vshll.u32 %v403_v18, %v410_v49 }
 0x139   : > { %v518_v12 = vsub.s32 4294967266, %v513_v51  ;;  %v514_v59 = vsub.s32 32, %v513_v51  ;;  %v515_v62 = vshll.u32 %v506_v44, %v513_v51  ;;  %vm536_vm2 = vcmp.lt.s32.totalorder %v535_v42, 2 }
 0x13a   : > { %v416_v56 = vadd.s32 127, %v415_v13  ;;  %v413_v61 = vshrl.u32 %v395_v52, %v411_v55 }
 0x13b   : > { %v519_v3 = vadd.s32 127, %v518_v12  ;;  %v516_v63 = vshrl.u32 %v498_v57, %v514_v59 }
 0x13c   : > { %v417_v15 = vshll.u32 %v416_v56, 23  ;;  %v414_v7 = vor.u32 %v413_v61, %v412_v60 }
 0x13d   : > { %v520_v10 = vshll.u32 %v519_v3, 23  ;;  %v517_v17 = vor.u32 %v516_v63, %v515_v62 }
 0x13e   : > { %v418_v9 = vor.u32 4788187, %v417_v15  ;;  %v421_v23 = vcvt.s32.f32 %v414_v7 }
 0x13f   : > { %v521_v58 = vor.u32 4788187, %v520_v10  ;;  %v524_v0 = vcvt.s32.f32 %v517_v17 }
 0x140   : > { %v419_v22 = vand.u32 2147483647, %v418_v9 }
 0x141   : > { %v522_v24 = vand.u32 2147483647, %v521_v58 }
 0x142   : > { %v422_v1 = vmul.f32 %v421_v23, %v419_v22 }
 0x143   : > { %v525_v21 = vmul.f32 %v524_v0, %v522_v24 }
 0x144   : > { %v423_v4 = vxor.u32 2147483648, %v422_v1 }
 0x145   : > { %v526_v19 = vxor.u32 2147483648, %v525_v21 }
 0x146   : > { %v424_v25 = vsel %vm341_vm3, %v423_v4, %v422_v1  ;;  %vm744_vm3 = vcmp.lt.s32.totalorder %v743_v43, 2 }
 0x147   : > { %v527_v8 = vsel %vm444_vm4, %v526_v19, %v525_v21  ;;  %v427_v20 = vsel %vm340_vm5, %v2791_v53, %v424_v25  ;;  %vm431_vm4 = vweird.f32 %v2791_v53  ;;  %vm534_vm5 = vweird.f32 %v2794_v54 }
 0x148   : > { %v530_v11 = vsel %vm443_vm6, %v2794_v54, %v527_v8  ;;  %2110 = vcosq.f32 %v427_v20 }
 0x149   : > { %2112 = vsinq.f32 %v427_v20 }
 0x14a   : > { %2114 = vcosq.f32 %v530_v11 }
 0x14b   : > { %2116 = vsinq.f32 %v530_v11 }
 0x152   : > { %v2111_v34 = vpop.eup %2110 }
 0x153   : > { %v2113_v36 = vpop.eup %2112  ;;  %v438_v44 = vxor.u32 2147483648, %v2111_v34 }
 0x154   : > { %v2115_v38 = vpop.eup %2114  ;;  %v435_v18 = vxor.u32 2147483648, %v2113_v36 }
 0x155   : > { %v2117_v40 = vpop.eup %2116  ;;  %v541_v45 = vxor.u32 2147483648, %v2115_v38  ;;  %v439_v37 = vsel %vm437_vm8, %v438_v44, %v2113_v36  ;;  %v646_v46 = vsel %vm644_vm10, %v438_v44, %v2113_v36 }
 0x156   : > { %v538_v39 = vxor.u32 2147483648, %v2117_v40  ;;  %v436_v35 = vsel %vm434_vm7, %v2111_v34, %v435_v18  ;;  %v643_v16 = vsel %vm641_vm9, %v2111_v34, %v435_v18 }
 0x157   : > { %v542_v51 = vsel %vm540_vm14, %v541_v45, %v2117_v40  ;;  %v750_v12 = vsel %vm748_vm0, %v541_v45, %v2117_v40  ;;  %v440_v52 = vsel %vm433_vm11, %v436_v35, %v439_v37  ;;  %v647_v55 = vsel %vm640_vm12, %v643_v16, %v646_v46 }
 0x158   : > { %v539_v49 = vsel %vm537_vm13, %v2115_v38, %v538_v39  ;;  %v747_v13 = vsel %vm745_vm15, %v2115_v38, %v538_v39  ;;  %v2934_v59 = vsel %vm431_vm4, nan, %v440_v52  ;;  %v2936_v3 = vsel %vm431_vm4, nan, %v647_v55 }
 0x159   : > { %v543_v56 = vsel %vm536_vm2, %v539_v49, %v542_v51  ;;  %v751_v57 = vsel %vm744_vm3, %v747_v13, %v750_v12 }
 0x15a   : > { %v2938_v63 = vsel %vm534_vm5, nan, %v543_v56  ;;  %v2940_v10 = vsel %vm534_vm5, nan, %v751_v57 }
 0x1dd   : > { %v1908_v41 = vpop.f32.mrb[4].mxu0 }
 0x1de   : > { %v1260_v14 = vpop.f32.mrb[5].mxu0 }
 0x1df   : > { %v1909_v33 = vpop.f32.mrb[6].mxu0 }
 0x1e0   : > { %v1263_v47 = vpop.f32.mrb[7].mxu0 }
 0x1e5   : > { %v1914_v60 = vpop.f32.mrb[8].mxu0 }
 0x1e6   : > { %v1346_v61 = vsub.f32 %v1908_v41, %v1914_v60  ;;  %v1309_v15 = vpop.f32.mrb[9].mxu0  ;;  %v1869_v60 = vld [vmem:[%s258_s8] ss:$0 sm:$0xff] }
 0x1e7   : > { %v1344_v62 = vsub.f32 %v1260_v14, %v1309_v15  ;;  %v1915_v53 = vpop.f32.mrb[10].mxu0 }
 0x1e8   : > { %v1354_v7 = vmul.f32 %v1346_v61, %v2936_v3  ;;  %v1376_v9 = vmul.f32 %v1346_v61, %v2934_v59  ;;  %v1347_v54 = vsub.f32 %v1909_v33, %v1915_v53  ;;  %v1312_v17 = vpop.f32.mrb[11].mxu0 }
 0x1e9   : > { %v1352_v58 = vmul.f32 %v1344_v62, %v2936_v3  ;;  %v1374_v22 = vmul.f32 %v1344_v62, %v2934_v59  ;;  %v1345_v23 = vsub.f32 %v1263_v47, %v1312_v17 }
 0x1ea   : > { %v1355_v24 = vmul.f32 %v1347_v54, %v2940_v10  ;;  %v1377_v0 = vmul.f32 %v1347_v54, %v2938_v63 }
 0x1eb   : > { %v1353_v1 = vmul.f32 %v1345_v23, %v2940_v10  ;;  %v1375_v21 = vmul.f32 %v1345_v23, %v2938_v63 }
 0x1ed   : > { %v1918_v4 = vpop.f32.mrb[0].mxu0 }
 0x1ee   : > { %v1350_v19 = vmul.f32 %v1918_v4, %v2934_v59  ;;  %v1380_v25 = vmul.f32 %v1918_v4, %v2936_v3  ;;  %v1325_v8 = vpop.f32.mrb[1].mxu0 }
 0x1ef   : > { %v1348_v48 = vmul.f32 %v1325_v8, %v2934_v59  ;;  %v1378_v20 = vmul.f32 %v1325_v8, %v2936_v3  ;;  %v1919_v31 = vpop.f32.mrb[2].mxu0 }
 0x1f0   : > { %v1358_v11 = vadd.f32 %v1354_v7, %v1350_v19  ;;  %v1384_v26 = vsub.f32 %v1376_v9, %v1380_v25  ;;  %v1351_v28 = vmul.f32 %v1919_v31, %v2938_v63  ;;  %v1381_v29 = vmul.f32 %v1919_v31, %v2940_v10  ;;  %v1328_v30 = vpop.f32.mrb[3].mxu0 }
 0x1f1   : > { %v1356_v5 = vadd.f32 %v1352_v58, %v1348_v48  ;;  %v1382_v32 = vsub.f32 %v1374_v22, %v1378_v20  ;;  %v1349_v34 = vmul.f32 %v1328_v30, %v2938_v63  ;;  %v1379_v36 = vmul.f32 %v1328_v30, %v2940_v10 }
 0x1f2   : > { %v1359_v27 = vadd.f32 %v1355_v24, %v1351_v28  ;;  %v1385_v6 = vsub.f32 %v1377_v0, %v1381_v29  ;;  %v1413_v7 = vsub.s32 0, %v2666_v2 }
 0x1f3   : > { %v1357_v38 = vadd.f32 %v1353_v1, %v1349_v34  ;;  %v1383_v40 = vsub.f32 %v1375_v21, %v1379_v36 }
 0x1f4   : > { %v1367_v42 = vadd.f32 %v1359_v27, %v1358_v11  ;;  %v1393_v43 = vadd.f32 %v1385_v6, %v1384_v26 }
 0x1f5   : > { %v1360_v18 = vadd.f32 %v1357_v38, %v1356_v5  ;;  %v1386_v44 = vadd.f32 %v1383_v40, %v1382_v32 }
 0x1f6   : > { %v1368_v41 = vrot.slane %v1367_v42, 4  ;;  %v1394_v39 = vrot.slane %v1393_v43, 4 }
 0x1f7   : > { %v1361_v45 = vrot.slane %v1360_v18, 4  ;;  %v1387_v14 = vrot.slane %v1386_v44, 4 }
 0x1f8   : > { %v1369_v33 = vadd.f32 %v1368_v41, %v1367_v42  ;;  %v1395_v35 = vadd.f32 %v1394_v39, %v1393_v43 }
 0x1f9   : > { %v1362_v37 = vadd.f32 %v1361_v45, %v1360_v18  ;;  %v1388_v16 = vadd.f32 %v1387_v14, %v1386_v44  ;;  %v1603_v14 = vld [vmem:[%s2655_s18 + $0x10] sm:$0xff] }
 0x1fa   : > { %v1370_v46 = vrot.slane %v1369_v33, 2  ;;  %v1396_v47 = vrot.slane %v1395_v35, 2 }
 0x1fb   : > { %v1363_v49 = vrot.slane %v1362_v37, 2  ;;  %v1389_v51 = vrot.slane %v1388_v16, 2 }
 0x1fc   : > { %v1371_v13 = vadd.f32 %v1370_v46, %v1369_v33  ;;  %v1397_v12 = vadd.f32 %v1396_v47, %v1395_v35  ;;  %v1604_v35 = vld [vmem:[%s2655_s18 + $0x18] sm:$0xff]  ;;  %v1602_v46 = vld [vmem:[%s2655_s18 + $0x8] sm:$0xff] }
 0x1fd   : > { %v1364_v52 = vadd.f32 %v1363_v49, %v1362_v37  ;;  %v1390_v55 = vadd.f32 %v1389_v51, %v1388_v16 }
 0x1fe   : > { %v1372_v56 = vrot.slane %v1371_v13, 1  ;;  %v1398_v57 = vrot.slane %v1397_v12, 1 }
 0x1ff   : > { %v1365_v61 = vrot.slane %v1364_v52, 1  ;;  %v1391_v15 = vrot.slane %v1390_v55, 1 }
 0x200   : > { %v1373_v62 = vadd.f32 %v1372_v56, %v1371_v13  ;;  %v1399_v53 = vadd.f32 %v1398_v57, %v1397_v12 }
 0x201   : > { %v1366_v9 = vadd.f32 %v1365_v61, %v1364_v52  ;;  %v1392_v54 = vadd.f32 %v1391_v15, %v1390_v55 }
 0x202   : > { %v1408_v17 = vmul.f32 %v1869_v60, %v1373_v62  ;;  %v1410_v58 = vmul.f32 %v1869_v60, %v1399_v53 }
 0x203   : > { %v1407_v22 = vmul.f32 %v1869_v60, %v1366_v9  ;;  %v1409_v23 = vmul.f32 %v1869_v60, %v1392_v54 }
 0x204   : > { %v1418_v24 = vrot.slane %v1408_v17, %v1413_v7  ;;  %v1430_v0 = vrot.slane %v1410_v58, %v1413_v7 }
 0x205   : > { %v1414_v1 = vrot.slane %v1407_v22, %v1413_v7  ;;  %v1426_v21 = vrot.slane %v1409_v23, %v1413_v7 }
 0x206   : > { %v1421_v4 = vmul.f32 %v1418_v24, %v2934_v59  ;;  %v1422_v19 = vmul.f32 %v1418_v24, %v2938_v63  ;;  %v1433_v25 = vmul.f32 %v1430_v0, %v2936_v3  ;;  %v1434_v8 = vmul.f32 %v1430_v0, %v2940_v10 }
 0x207   : > { %v1419_v2 = vmul.f32 %v1414_v1, %v2934_v59  ;;  %v1420_v48 = vmul.f32 %v1414_v1, %v2938_v63  ;;  %v1431_v20 = vmul.f32 %v1426_v21, %v2936_v3  ;;  %v1432_v31 = vmul.f32 %v1426_v21, %v2940_v10 }
 0x208   : > { %v1437_v11 = vsub.f32 %v1421_v4, %v1433_v25  ;;  %v1438_v26 = vsub.f32 %v1422_v19, %v1434_v8  ;;  %v1439_v28 = vmul.f32 %v1426_v21, %v2934_v59  ;;  %v1440_v29 = vmul.f32 %v1426_v21, %v2938_v63 }
 0x209   : > { %v1435_v30 = vsub.f32 %v1419_v2, %v1431_v20  ;;  %v1436_v5 = vsub.f32 %v1420_v48, %v1432_v31  ;;  %v1443_v32 = vmul.f32 %v1414_v1, %v2936_v3  ;;  %v1444_v34 = vmul.f32 %v1414_v1, %v2940_v10 }
 0x20a   : > { %v1452_v36 = vpack.c.bf16 %v1438_v26, %v1437_v11  ;;  %v1441_v27 = vmul.f32 %v1430_v0, %v2934_v59  ;;  %v1442_v6 = vmul.f32 %v1430_v0, %v2938_v63  ;;  %v1445_v38 = vmul.f32 %v1418_v24, %v2936_v3 }
 0x20b   : > { %v1451_v40 = vpack.c.bf16 %v1436_v5, %v1435_v30  ;;  %v1447_v42 = vadd.f32 %v1443_v32, %v1439_v28  ;;  %v1448_v43 = vadd.f32 %v1444_v34, %v1440_v29  ;;  %v1446_v18 = vmul.f32 %v1418_v24, %v2940_v10 }
 0x20c   : > { %v1449_v44 = vadd.f32 %v1445_v38, %v1441_v27 }
 0x20d   : > { %1922 = vmatprep.mubr.bf16.mxu1 %v1451_v40  ;;  %v1453_v41 = vpack.c.bf16 %v1448_v43, %v1447_v42  ;;  %v1450_v39 = vadd.f32 %v1446_v18, %v1442_v6 }
 0x20e   : > { %1923 = vmatmul.mubr.bf16.vlgmr.msra.gmra.mrb[0].mxu1 %v1452_v36 }
 0x20f   : > { %1926 = vmatprep.mubr.bf16.mxu1 %v1453_v41  ;;  %1931 = vmatpush3.bf16.xpose.msra.mxu1 %v2776_v50  ;;  %v1454_v59 = vpack.c.bf16 %v1450_v39, %v1449_v44  ;;  %v1601_v50 = vld [vmem:[%s2655_s18] sm:$0xff] }
 0x216   : > { %1927 = vmatmul.mubr.bf16.gmra.mrb[4].mxu1 %v1454_v59 }
 0x217   : > { %1932 = vmatprep.mubr.bf16.mxu1 %v1451_v40 }
 0x222   : > { %1933 = vmatmul.mubr.bf16.vlgmr.msra.gmra.mrb[4].mxu1 %v1452_v36 }
 0x223   : > { %1936 = vmatprep.mubr.bf16.mxu1 %v1453_v41 }
 0x22a   : > { %1937 = vmatmul.mubr.bf16.gmra.mrb[8].mxu1 %v1454_v59 }
 0x2e1   : > { %v1924_v3 = vpop.f32.mrb[0].mxu1 }
 0x2e2   : > { %v2978_v63 = vpop.f32.mrb[1].mxu1 }
 0x2e3   : > { %v2980_v10 = vpop.f32.mrb[2].mxu1 }
 0x2e4   : > { %v2982_v45 = vpop.f32.mrb[3].mxu1 }
 0x2f5   : > { %v1934_v33 = vpop.f32.mrb[4].mxu1 }
 0x2f6   : > { %v1611_v37 = vadd.f32 %v1934_v33, %v1603_v14  ;;  %v1554_v16 = vpop.f32.mrb[5].mxu1 }
 0x2f7   : > { %v1609_v47 = vadd.f32 %v1601_v50, %v1554_v16  ;;  %v1935_v49 = vpop.f32.mrb[6].mxu1 }
 0x2f8   : > { %1615 = vst.msk [vmem:[%s2655_s18 + $0x10] sm:$0xff] %vm1197_vm1, %v1611_v37  ;;  %v1612_v51 = vadd.f32 %v1935_v49, %v1604_v35  ;;  %v1557_v13 = vpop.f32.mrb[7].mxu1 }
 0x2f9   : > { %1613 = vst.msk [vmem:[%s2655_s18] sm:$0xff] %vm1197_vm1, %v1609_v47  ;;  %v1610_v12 = vadd.f32 %v1602_v46, %v1557_v13 }
 0x2fa   : > { %1616 = vst.msk [vmem:[%s2655_s18 + $0x18] sm:$0xff] %vm1197_vm1, %v1612_v51 }
 0x2fb   : > { %1614 = vst.msk [vmem:[%s2655_s18 + $0x8] sm:$0xff] %vm1197_vm1, %v1610_v12 }
 0x2fc   : > { %2219 = shalt.err (!%p2216_p10)
}
 0x2fd   : > { %s2220_s5 = scalar_lea.hbm %s2999_s4, 512  ;;  %s2224_s11 = scalar_lea.hbm %s3166_s27, 1024 }
 0x2fe   : > { %p2221_p11 = scmp.ne.s32.totalorder %s2999_s4, %s2220_s5  ;;  %p2225_p3 = scmp.lt.u32.totalorder %s2999_s4, %s3166_s27 }
 0x2ff   : > { %p2226_p13 = scmp.lt.u32.totalorder %s2224_s11, %s2220_s5  ;;  %p2228_p2 = scmp.lt.u32.totalorder %s2220_s5, %s2999_s4 }
 0x300   : > { %p2222_p6 = pnand %p2221_p11, %p3167_p5 }
 0x301   : > { %p2227_p0 = por %p2226_p13, %p2225_p3 }
 0x302   : > { %p2223_p7 = pneg %p2222_p6 }
 0x303   : > { %p2229_p8 = por %p2228_p2, %p2227_p0 }
 0x305   : > { %p2230_p12 = pnand %p2229_p8, %p2223_p7 }
 0x307   : > { %2233 = shalt.err (!%p2230_p12)
}
 0x308   : > { %s2383_s6 = smov 128   ;;  %s2384_s7 = smov 8   ;;  %v1938_v52 = vpop.f32.mrb[8].mxu1  ;;  %v1587_v55 = vld [vmem:[%s2653_s13 + $0x10] sm:$0xff]  ;;  %v1585_v60 = vld [vmem:[%s2653_s13] sm:$0xff]  ;;  %v1588_v62 = vld [vmem:[%s2653_s13 + $0x18] sm:$0xff] }
 0x309   : > { %1973 = dma.vmem_to_hbm [thread:$0]  (%p3167_p5), %s3001_s3, 512, %s2999_s4, %s1623_s23, %s2383_s6, %s2383_s6, %s2384_s7   ;;  %v1591_v56 = vsub.f32 %v1924_v3, %v1938_v52  ;;  %v1570_v57 = vpop.f32.mrb[9].mxu1 }
 0x30a   : > { %v1589_v61 = vsub.f32 %v2978_v63, %v1570_v57  ;;  %v1939_v15 = vpop.f32.mrb[10].mxu1  ;;  %v1586_v54 = vld [vmem:[%s2653_s13 + $0x8] sm:$0xff]  ;;  %s1636_s3 = sshll.u32 %s2653_s13, 4  ;;  %s3168_s9 = sld [smem:[#allocation23_spill]]  ;;  %s3053_s3 = int_to_ptr.vmem [resolvable:$true] %s1636_s3 }
 0x30b   : > { %v1595_v53 = vadd.f32 %v1591_v56, %v1587_v55  ;;  %v1592_v7 = vsub.f32 %v2980_v10, %v1939_v15  ;;  %v1573_v9 = vpop.f32.mrb[11].mxu1  ;;  %s1618_s29 = scalar_lea.sflag [#allocation4], %s2650_s10  ;;  %s2234_s5 = scalar_lea.vmem %s3053_s3, 512 }
 0x30c   : > { %v1593_v17 = vadd.f32 %v1589_v61, %v1585_v60  ;;  %v1590_v58 = vsub.f32 %v2982_v45, %v1573_v9  ;;  %p2235_p1 = scmp.ne.s32.totalorder %s3053_s3, %s2234_s5  ;;  %s2385_s21 = smov [#allocation8]  }
 0x30d   : > { %1599 = vst.msk [vmem:[%s2653_s13 + $0x10] sm:$0xff] %vm1197_vm1, %v1595_v53  ;;  %v1596_v22 = vadd.f32 %v1592_v7, %v1588_v62  ;;  %s2238_s2 = sshll.u32 %s2385_s21, 4  ;;  %s2239_s2 = int_to_ptr.vmem [resolvable:$false] %s2238_s2 }
 0x30e   : > { %1597 = vst.msk [vmem:[%s2653_s13] sm:$0xff] %vm1197_vm1, %v1593_v17  ;;  %v1594_v23 = vadd.f32 %v1590_v58, %v1586_v54  ;;  %p2236_p9 = pnand %p2235_p1, %p3167_p5  ;;  %p2241_p10 = scmp.lt.s32.totalorder %s3053_s3, %s2239_s2 }
 0x30f   : > { %1600 = vst.msk [vmem:[%s2653_s13 + $0x18] sm:$0xff] %vm1197_vm1, %v1596_v22 }
 0x310   : > { %s3051_s14 = scalar_lea.hbm %s3168_s9, %s1878_s26  ;;  %1598 = vst.msk [vmem:[%s2653_s13 + $0x8] sm:$0xff] %vm1197_vm1, %v1594_v23  ;;  %p2237_p4 = pneg %p2236_p9 }
 0x311   : > { %s2240_s26 = scalar_lea.vmem %s2239_s2, 1024 }
 0x312   : > { %p2242_p11 = scmp.lt.s32.totalorder %s2240_s26, %s2234_s5 }
 0x314   : > { %p2243_p6 = por %p2242_p11, %p2241_p10 }
 0x316   : > { %p2244_p7 = pnand %p2243_p6, %p2237_p4 }
 0x318   : > { %2247 = shalt.err (!%p2244_p7)
}
 0x319   : > { %s2248_s13 = scalar_lea.hbm %s3051_s14, 512  ;;  %s2252_s18 = scalar_lea.hbm %s3168_s9, 1024 }
 0x31a   : > { %p2249_p3 = scmp.ne.s32.totalorder %s3051_s14, %s2248_s13  ;;  %p2253_p2 = scmp.lt.u32.totalorder %s3051_s14, %s3168_s9 }
 0x31b   : > { %p2254_p8 = scmp.lt.u32.totalorder %s2252_s18, %s2248_s13  ;;  %p2256_p1 = scmp.lt.u32.totalorder %s2248_s13, %s3051_s14 }
 0x31c   : > { %p2250_p13 = pnand %p2249_p3, %p3167_p5 }
 0x31d   : > { %p2255_p12 = por %p2254_p8, %p2253_p2 }
 0x31e   : > { %p2251_p0 = pneg %p2250_p13 }
 0x31f   : > { %p2257_p9 = por %p2256_p1, %p2255_p12 }
 0x321   : > { %p2258_p4 = pnand %p2257_p9, %p2251_p0 }
 0x323   : > { %2261 = shalt.err (!%p2258_p4)
}
 0x324   : > { %1972 = dma.vmem_to_hbm [thread:$0]  (%p3167_p5), %s3053_s3, 512, %s3051_s14, %s1618_s29, %s2383_s6, %s2383_s6, %s2384_s7  }
 0x325 PF: > { %s3169_s23 = sld [smem:[#allocation16_spill]]  ;;  %s3170_s5 = sld [smem:[#allocation20_spill]] }
 0x326   : > { %p1997_p10 = scmp.ge.s32.totalorder %s2368_s25, 2 }
 0x32b   : > { %s1667_s21 = sand.u32 1, %s3169_s23   ;;  %p3171_p11 = scmp.ne.s32.totalorder %s3170_s5, 0 }
 0x32c   : > { %s1668_s2 = scalar_lea.sflag [#allocation4], %s1667_s21 }
 0x32d   : > { %p1988_p6 = pnand %p1997_p10, %p3171_p11 }
 0x32f   : > { %2319 = dma.done.wait (!%p1988_p6), %s1668_s2, 512  }
 0x330   : > { %2321 = vsyncadd (!%p1988_p6), %s1668_s2, 4294966784  ;;  %s1677_s28 = scalar_lea.sflag [#allocation10], %s1667_s21 }
 0x331   : > { %2323 = dma.done.wait (!%p1988_p6), %s1677_s28, 512  }
 0x332   : > { %2325 = vsyncadd (!%p1988_p6), %s1677_s28, 4294966784  ;;  %s27_s25 = sadd.s32 1, %s2368_s25   ;;  %s3172_s10 = smov %s2554_s15 }
 0x333   : > { %p24_p7 = scmp.ge.s32.totalorder %s27_s25, 6   ;;  %s3173_s21 = sld [smem:[#allocation18_spill]] }
 0x334   : > { %s3174_s6 = sld [smem:[#allocation21_spill]]  ;;  %s3175_s15 = smov %s2332_s16 }
 0x335   : > { %s3176_s16 = smov %s2336_s17  ;;  %s3177_s17 = smov %s2551_s30 }
 0x336   : > { %s3178_s18 = smov %s2344_s19  ;;  %s3179_s19 = smov %s2348_s20 }
 0x337   : > { %s3180_s20 = smov %s3172_s10  ;;  %s3181_s22 = smov %s2364_s24 }
 0x338   : > { %s3182_s23 = smov %s3185_s12  ;;  %26 = sbr.rel (!%p24_p7) target bundleno = 17 (0x11), region = 115 }
 0x33a   : > { %s3183_s24 = smov %s3174_s6 }
 0x33f   :  { %1682 = vsyncpa [#allocation3], 1 }
 0x340   :  { %1684 = vsyncpa [#allocation3 + $0x1], 1 }
 0x341   :  { %1685 = vsyncpa [#allocation6], 1 }
 0x342   :  { %1687 = vsyncpa [#allocation6 + $0x1], 1 }
 0x343   :  { %1688 = vsyncpa [#allocation4], 1 }
 0x344   :  { %1690 = vsyncpa [#allocation4 + $0x1], 1 }
 0x345   :  { %1691 = vsyncpa [#allocation10], 1 }
 0x346   :  { %1693 = vsyncpa [#allocation10 + $0x1], 1 }

</bundles_post_ra>
